<compile_context>
chip_gen: v5e
topology: v5e:2x2
jax: 0.10.0
libtpu: 0.0.40
codegen_flags: <defaults>
</compile_context>

<pallas_src>
import functools

import jax
import jax.numpy as jnp
from jax import lax
from jax.experimental import pallas as pl
from jax.experimental.pallas import tpu as pltpu


def _round_up(x, m):
    return (x + m - 1) // m * m


# ---------------------------------------------------------------------------
# Pallas kernel: whole LSTM forward in one invocation (grid=(1,)).
#   x_ref   : (S*Bp, E)    time-major rows (row t*Bp + b == x_emb[b, t])
#   wx_ref  : (E, 4Hp)     input part of the stacked gate weights  [F|I|C|O]
#   wc_ref  : (Hp, 4Hp)    cell-state part of the stacked gate weights
#   b_ref   : (1, 4Hp)     stacked gate bias (zero in padded lanes)
#   allh_ref: (S*Bp, Hp)   all hidden states, time-major rows
#   cfin_ref: (Bp, Hp)     final cell state (classifier applied in wrapper)
#   g_sc    : (S*Bp, 4Hp)  scratch: precomputed input projection x@W_x + b
#   c_sc    : ((S+1)*Bp,Hp) scratch: cell-state history, c_{-1}=0 in rows 0:Bp
# ---------------------------------------------------------------------------
def lstm_forward_kernel(x_ref, wx_ref, wc_ref, b_ref,          # inputs
                        allh_ref, cfin_ref,                     # outputs
                        g_sc, c_sc,                             # scratch
                        *, seq, batch_p, hidden_p):
    Bp = batch_p
    Hp = hidden_p

    # (1) Non-recurrent input projection for ALL timesteps: one bulk MXU matmul.
    g_sc[...] = (jnp.dot(x_ref[...], wx_ref[...],
                         preferred_element_type=jnp.float32)
                 + b_ref[...])                                   # (S*Bp, 4Hp)

    # Recurrence-critical [F|I|C] weight columns only; O is deferred.
    wc_fic = wc_ref[:, :3 * Hp]                                  # (Hp, 3Hp)

    # c_{-1} = 0 (row block 0 of the cell-state history).
    c0 = jnp.zeros((Bp, Hp), jnp.float32)
    c_sc[0:Bp, :] = c0

    # (2) Serial recurrence: only F/I/C gates and c_t on the critical path.
    # At S=8 full unroll is fine; for realistic S use a time-chunked grid or
    # a partial unroll factor instead.
    def step(t, c_prev):
        row = pl.multiple_of(t * Bp, Bp)
        g_row = g_sc[pl.ds(row, Bp), :]                          # (Bp, 4Hp)
        gates = (g_row[:, :3 * Hp]
                 + jnp.dot(c_prev, wc_fic,
                           preferred_element_type=jnp.float32))  # (Bp, 3Hp)
        f_g = jax.nn.sigmoid(gates[:, 0 * Hp:1 * Hp])
        i_g = jax.nn.sigmoid(gates[:, 1 * Hp:2 * Hp])
        c_g = jnp.tanh(gates[:, 2 * Hp:3 * Hp])
        c_now = f_g * c_prev + i_g * c_g
        row_next = pl.multiple_of((t + 1) * Bp, Bp)
        c_sc[pl.ds(row_next, Bp), :] = c_now                     # history store
        return c_now

    c_final = lax.fori_loop(0, seq, step, c0, unroll=True)
    cfin_ref[...] = c_final

    # (3) Deferred O-gate + hidden states, fully vectorized over all steps:
    #     h_t = tanh(c_t) * sigmoid(x_t@Wx_o + b_o + c_{t-1}@Wc_o)
    c_shift = c_sc[0:seq * Bp, :]                                # c_{t-1} rows
    c_all = c_sc[Bp:(seq + 1) * Bp, :]                           # c_t rows
    o_pre = (g_sc[:, 3 * Hp:4 * Hp]
             + jnp.dot(c_shift, wc_ref[:, 3 * Hp:4 * Hp],
                       preferred_element_type=jnp.float32))
    allh_ref[...] = jnp.tanh(c_all) * jax.nn.sigmoid(o_pre)


def lstm_classifier_pallas(x_tok, emb_table, w_gates, b_gates, w_cls, b_cls,
                           hidden):
    """x_tok: (B, S) int32 token ids.  Returns (all_h (B,S,H), pre (B,C))."""
    B, S = x_tok.shape
    E = emb_table.shape[1]
    H = hidden
    Hp = _round_up(H, 128)       # lane-dense hidden dim
    Bp = _round_up(B, 8)         # sublane-dense batch

    # Split stacked gate weights: cat(x, c) @ W == x @ W[:E] + c @ W[E:]
    w_x = w_gates[:E]                                            # (E, 4H)
    w_c = w_gates[E:]                                            # (H, 4H)

    # Zero-pad each gate block H -> Hp (and W_c rows H -> Hp).  Zero weights
    # and zero bias in padded lanes keep padded lanes of c exactly 0.
    def pad_gate_cols(w, rows_out):
        rows_in = w.shape[0]
        out = jnp.zeros((rows_out, 4 * Hp), jnp.float32)
        for g in range(4):                                       # [F|I|C|O]
            out = out.at[:rows_in, g * Hp:g * Hp + H].set(
                w[:, g * H:(g + 1) * H])
        return out

    w_x_p = pad_gate_cols(w_x, E)                                # (E, 4Hp)
    w_c_p = pad_gate_cols(w_c, Hp)                               # (Hp, 4Hp)
    b_p = pad_gate_cols(b_gates, 1)                              # (1, 4Hp)

    # Time-major embedding gather straight into (S, Bp, E): no materialized
    # (B,S,E) + transpose.  Padded batch rows stay zero and are sliced off.
    x_sbe = emb_table[x_tok.T]                                   # (S, B, E)
    x_p = jnp.zeros((S, Bp, E), jnp.float32).at[:, :B, :].set(x_sbe)
    x2d = x_p.reshape(S * Bp, E)

    kernel = functools.partial(lstm_forward_kernel,
                               seq=S, batch_p=Bp, hidden_p=Hp)

    allh_2d, c_fin = pl.pallas_call(
        kernel,
        grid=(1,),
        out_shape=(jax.ShapeDtypeStruct((S * Bp, Hp), jnp.float32),
                   jax.ShapeDtypeStruct((Bp, Hp), jnp.float32)),
        in_specs=[
            pl.BlockSpec((S * Bp, E), lambda i: (0, 0)),         # x (time-major)
            pl.BlockSpec((E, 4 * Hp), lambda i: (0, 0)),         # W_x
            pl.BlockSpec((Hp, 4 * Hp), lambda i: (0, 0)),        # W_c
            pl.BlockSpec((1, 4 * Hp), lambda i: (0, 0)),         # gate bias
        ],
        out_specs=(
            pl.BlockSpec((S * Bp, Hp), lambda i: (0, 0)),        # all_h
            pl.BlockSpec((Bp, Hp), lambda i: (0, 0)),            # final c
        ),
        scratch_shapes=[
            pltpu.VMEM((S * Bp, 4 * Hp), jnp.float32),           # g_sc
            pltpu.VMEM(((S + 1) * Bp, Hp), jnp.float32),         # c_sc
        ],
        compiler_params=pltpu.CompilerParams(
            dimension_semantics=("arbitrary",),
            vmem_limit_bytes=32 * 1024 * 1024),
    )(x2d, w_x_p, w_c_p, b_p)

    # Un-pad and restore (B, S, H) layout (tiny at these sizes).
    all_h = allh_2d.reshape(S, Bp, Hp)[:, :B, :H].transpose(1, 0, 2)
    c_final = c_fin[:B, :H]

    # Classifier on the FINAL cell state (matches torch `self.classifier(c)`).
    pre = c_final @ w_cls + b_cls
    return all_h, pre


# ---------------------------------------------------------------------------
# Plain-JAX reference (mirrors the PyTorch forward) for a correctness check.
# ---------------------------------------------------------------------------
def reference_forward(x_tok, emb, w_gates, b_gates, w_cls, b_cls, hidden):
    x_emb = emb[x_tok]                                           # (B, S, E)
    B, S, _ = x_emb.shape
    H = hidden
    c = jnp.zeros((B, H), jnp.float32)
    all_h = []
    for i in range(S):
        xc = jnp.concatenate([x_emb[:, i], c], axis=1)
        g = xc @ w_gates + b_gates
        f_g = jax.nn.sigmoid(g[:, 0 * H:1 * H])
        i_g = jax.nn.sigmoid(g[:, 1 * H:2 * H])
        c_g = jnp.tanh(g[:, 2 * H:3 * H])
        o_g = jax.nn.sigmoid(g[:, 3 * H:4 * H])
        c = f_g * c + i_g * c_g
        h = jnp.tanh(c) * o_g
        all_h.append(h)
    pre = c @ w_cls + b_cls
    return jnp.stack(all_h, axis=1), pre


if __name__ == "__main__":
    # Model hyper-parameters (small, consistent with the module).
    word_size, embedding_num, hidden_fea, class_num = 50, 16, 32, 8
    B, S = 2, 8

    key = jax.random.PRNGKey(0)
    k_emb, k_w, k_b, k_wc, k_bc, k_x = jax.random.split(key, 6)

    # Deterministic parameter init (shapes match nn.Embedding / nn.Linear).
    emb_table = jax.random.normal(k_emb, (word_size, embedding_num), jnp.float32)
    # Gate weights stacked [F | I | C | O] along the output axis, stored as
    # (in_features, 4*hidden) so gates = cat(x, c) @ W + b.
    w_gates = 0.1 * jax.random.normal(
        k_w, (embedding_num + hidden_fea, 4 * hidden_fea), jnp.float32)
    b_gates = 0.1 * jax.random.normal(k_b, (1, 4 * hidden_fea), jnp.float32)
    w_cls = 0.1 * jax.random.normal(k_wc, (hidden_fea, class_num), jnp.float32)
    b_cls = 0.1 * jax.random.normal(k_bc, (1, class_num), jnp.float32)

    # Input token ids.
    x_tok = jax.random.randint(k_x, (B, S), 0, word_size, dtype=jnp.int32)

    all_h, pre = lstm_classifier_pallas(
        x_tok, emb_table, w_gates, b_gates, w_cls, b_cls, hidden_fea)
    jax.block_until_ready((all_h, pre))

    # Correctness check against the plain-JAX reference of the torch forward.
    ref_all_h, ref_pre = reference_forward(
        x_tok, emb_table, w_gates, b_gates, w_cls, b_cls, hidden_fea)
    assert jnp.allclose(all_h, ref_all_h, atol=1e-5, rtol=1e-5)
    assert jnp.allclose(pre, ref_pre, atol=1e-5, rtol=1e-5)

    # TODO(synk): embedding gather and the CrossEntropyLoss branch (y is not
    # None) are training/glue ops kept in plain JAX, not in the kernel.
    print("KERNEL_OK")
</pallas_src>

<mosaic_0001>
module attributes {stable_mosaic.version = 11 : i64} {
  func.func @lstm_forward_kernel(%arg0: i32, %arg1: memref<64x16xf32, #tpu.memory_space<vmem>>, %arg2: memref<16x512xf32, #tpu.memory_space<vmem>>, %arg3: memref<128x512xf32, #tpu.memory_space<vmem>>, %arg4: memref<1x512xf32, #tpu.memory_space<vmem>>, %arg5: memref<64x128xf32, #tpu.memory_space<vmem>>, %arg6: memref<8x128xf32, #tpu.memory_space<vmem>>, %arg7: memref<64x512xf32, #tpu.memory_space<vmem>>, %arg8: memref<72x128xf32, #tpu.memory_space<vmem>>) attributes {dimension_semantics = [#tpu.dimension_semantics<arbitrary>], iteration_bounds = array<i64: 1>, scalar_prefetch = 0 : i64, scratch_operands = 2 : i64, tpu.core_type = #tpu.core_type<tc>, window_params = [{pipeline_mode = #tpu.pipeline_mode<synchronous>, transform_indices = @transform_0, window_bounds = array<i64: 64, 16>}, {pipeline_mode = #tpu.pipeline_mode<synchronous>, transform_indices = @transform_1, window_bounds = array<i64: 16, 512>}, {pipeline_mode = #tpu.pipeline_mode<synchronous>, transform_indices = @transform_2, window_bounds = array<i64: 128, 512>}, {pipeline_mode = #tpu.pipeline_mode<synchronous>, transform_indices = @transform_3, window_bounds = array<i64: 1, 512>}, {pipeline_mode = #tpu.pipeline_mode<synchronous>, transform_indices = @transform_4, window_bounds = array<i64: 64, 128>}, {pipeline_mode = #tpu.pipeline_mode<synchronous>, transform_indices = @transform_5, window_bounds = array<i64: 8, 128>}]} {
    %c0 = arith.constant 0 : index
    %c0_0 = arith.constant 0 : index
    %0 = vector.load %arg1[%c0, %c0_0] : memref<64x16xf32, #tpu.memory_space<vmem>>, vector<64x16xf32>
    %c0_1 = arith.constant 0 : index
    %c0_2 = arith.constant 0 : index
    %1 = vector.load %arg2[%c0_1, %c0_2] : memref<16x512xf32, #tpu.memory_space<vmem>>, vector<16x512xf32>
    %cst = arith.constant dense<0.000000e+00> : vector<64x512xf32>
    %2 = tpu.matmul %0, %1, %cst {dimension_numbers = #tpu.dot_dimension_numbers<[1], [0], [0], [1], [0, 0, 1, 1], [], []>} : vector<64x16xf32>, vector<16x512xf32>, vector<64x512xf32> -> vector<64x512xf32>
    %c0_3 = arith.constant 0 : index
    %c0_4 = arith.constant 0 : index
    %3 = vector.load %arg4[%c0_3, %c0_4] : memref<1x512xf32, #tpu.memory_space<vmem>>, vector<1x512xf32>
    %4 = vector.broadcast %3 : vector<1x512xf32> to vector<64x512xf32>
    %5 = arith.addf %2, %4 : vector<64x512xf32>
    %c0_5 = arith.constant 0 : index
    %c0_6 = arith.constant 0 : index
    %6 = vector.load %arg7[%c0_5, %c0_6] : memref<64x512xf32, #tpu.memory_space<vmem>>, vector<64x512xf32>
    tpu.vector_store %arg7[%c0_5, %c0_6], %5 {strides = array<i32>} : memref<64x512xf32, #tpu.memory_space<vmem>>, vector<64x512xf32>,
    %c0_7 = arith.constant 0 : index
    %c0_8 = arith.constant 0 : index
    %7 = vector.load %arg3[%c0_7, %c0_8] : memref<128x512xf32, #tpu.memory_space<vmem>>, vector<128x384xf32>
    %cst_9 = arith.constant 0.000000e+00 : f32
    %8 = vector.broadcast %cst_9 : f32 to vector<8x128xf32>
    %c0_10 = arith.constant 0 : index
    %c0_11 = arith.constant 0 : index
    %9 = vector.load %arg8[%c0_10, %c0_11] : memref<72x128xf32, #tpu.memory_space<vmem>>, vector<8x128xf32>
    tpu.vector_store %arg8[%c0_10, %c0_11], %8 {strides = array<i32>} : memref<72x128xf32, #tpu.memory_space<vmem>>, vector<8x128xf32>,
    %c0_i32 = arith.constant 0 : i32
    %c8_i32 = arith.constant 8 : i32
    %10 = arith.muli %c0_i32, %c8_i32 : i32
    %11 = tpu.assume_multiple %10, 8 : i32
    %12 = arith.index_cast %11 : i32 to index
    %c0_12 = arith.constant 0 : index
    %13 = vector.load %arg7[%12, %c0_12] : memref<64x512xf32, #tpu.memory_space<vmem>>, vector<8x512xf32>
    %14 = vector.extract_strided_slice %13 {offsets = [0, 0], sizes = [8, 384], strides = [1, 1]} : vector<8x512xf32> to vector<8x384xf32>
    %cst_13 = arith.constant dense<0.000000e+00> : vector<8x384xf32>
    %15 = tpu.matmul %8, %7, %cst_13 {dimension_numbers = #tpu.dot_dimension_numbers<[1], [0], [0], [1], [0, 0, 1, 1], [], []>} : vector<8x128xf32>, vector<128x384xf32>, vector<8x384xf32> -> vector<8x384xf32>
    %16 = arith.addf %14, %15 : vector<8x384xf32>
    %17 = vector.extract_strided_slice %16 {offsets = [0, 0], sizes = [8, 128], strides = [1, 1]} : vector<8x384xf32> to vector<8x128xf32>
    %18 = arith.negf %17 : vector<8x128xf32>
    %19 = math.exp %18 : vector<8x128xf32>
    %cst_14 = arith.constant 1.000000e+00 : f32
    %20 = vector.broadcast %cst_14 : f32 to vector<8x128xf32>
    %21 = arith.addf %20, %19 : vector<8x128xf32>
    %22 = arith.divf %20, %21 : vector<8x128xf32>
    %23 = vector.extract_strided_slice %16 {offsets = [0, 128], sizes = [8, 128], strides = [1, 1]} : vector<8x384xf32> to vector<8x128xf32>
    %24 = arith.negf %23 : vector<8x128xf32>
    %25 = math.exp %24 : vector<8x128xf32>
    %cst_15 = arith.constant 1.000000e+00 : f32
    %26 = vector.broadcast %cst_15 : f32 to vector<8x128xf32>
    %27 = arith.addf %26, %25 : vector<8x128xf32>
    %28 = arith.divf %26, %27 : vector<8x128xf32>
    %29 = vector.extract_strided_slice %16 {offsets = [0, 256], sizes = [8, 128], strides = [1, 1]} : vector<8x384xf32> to vector<8x128xf32>
    %30 = math.tanh %29 : vector<8x128xf32>
    %31 = arith.mulf %22, %8 : vector<8x128xf32>
    %32 = arith.mulf %28, %30 : vector<8x128xf32>
    %33 = arith.addf %31, %32 : vector<8x128xf32>
    %c1_i32 = arith.constant 1 : i32
    %34 = arith.addi %c0_i32, %c1_i32 : i32
    %c8_i32_16 = arith.constant 8 : i32
    %35 = arith.muli %34, %c8_i32_16 : i32
    %36 = tpu.assume_multiple %35, 8 : i32
    %37 = arith.index_cast %36 : i32 to index
    %c0_17 = arith.constant 0 : index
    %38 = vector.load %arg8[%37, %c0_17] : memref<72x128xf32, #tpu.memory_space<vmem>>, vector<8x128xf32>
    tpu.vector_store %arg8[%37, %c0_17], %33 {strides = array<i32>} : memref<72x128xf32, #tpu.memory_space<vmem>>, vector<8x128xf32>,
    %c1_i32_18 = arith.constant 1 : i32
    %c8_i32_19 = arith.constant 8 : i32
    %39 = arith.muli %c1_i32_18, %c8_i32_19 : i32
    %40 = tpu.assume_multiple %39, 8 : i32
    %41 = arith.index_cast %40 : i32 to index
    %c0_20 = arith.constant 0 : index
    %42 = vector.load %arg7[%41, %c0_20] : memref<64x512xf32, #tpu.memory_space<vmem>>, vector<8x512xf32>
    %43 = vector.extract_strided_slice %42 {offsets = [0, 0], sizes = [8, 384], strides = [1, 1]} : vector<8x512xf32> to vector<8x384xf32>
    %cst_21 = arith.constant dense<0.000000e+00> : vector<8x384xf32>
    %44 = tpu.matmul %33, %7, %cst_21 {dimension_numbers = #tpu.dot_dimension_numbers<[1], [0], [0], [1], [0, 0, 1, 1], [], []>} : vector<8x128xf32>, vector<128x384xf32>, vector<8x384xf32> -> vector<8x384xf32>
    %45 = arith.addf %43, %44 : vector<8x384xf32>
    %46 = vector.extract_strided_slice %45 {offsets = [0, 0], sizes = [8, 128], strides = [1, 1]} : vector<8x384xf32> to vector<8x128xf32>
    %47 = arith.negf %46 : vector<8x128xf32>
    %48 = math.exp %47 : vector<8x128xf32>
    %cst_22 = arith.constant 1.000000e+00 : f32
    %49 = vector.broadcast %cst_22 : f32 to vector<8x128xf32>
    %50 = arith.addf %49, %48 : vector<8x128xf32>
    %51 = arith.divf %49, %50 : vector<8x128xf32>
    %52 = vector.extract_strided_slice %45 {offsets = [0, 128], sizes = [8, 128], strides = [1, 1]} : vector<8x384xf32> to vector<8x128xf32>
    %53 = arith.negf %52 : vector<8x128xf32>
    %54 = math.exp %53 : vector<8x128xf32>
    %cst_23 = arith.constant 1.000000e+00 : f32
    %55 = vector.broadcast %cst_23 : f32 to vector<8x128xf32>
    %56 = arith.addf %55, %54 : vector<8x128xf32>
    %57 = arith.divf %55, %56 : vector<8x128xf32>
    %58 = vector.extract_strided_slice %45 {offsets = [0, 256], sizes = [8, 128], strides = [1, 1]} : vector<8x384xf32> to vector<8x128xf32>
    %59 = math.tanh %58 : vector<8x128xf32>
    %60 = arith.mulf %51, %33 : vector<8x128xf32>
    %61 = arith.mulf %57, %59 : vector<8x128xf32>
    %62 = arith.addf %60, %61 : vector<8x128xf32>
    %c1_i32_24 = arith.constant 1 : i32
    %63 = arith.addi %c1_i32_18, %c1_i32_24 : i32
    %c8_i32_25 = arith.constant 8 : i32
    %64 = arith.muli %63, %c8_i32_25 : i32
    %65 = tpu.assume_multiple %64, 8 : i32
    %66 = arith.index_cast %65 : i32 to index
    %c0_26 = arith.constant 0 : index
    %67 = vector.load %arg8[%66, %c0_26] : memref<72x128xf32, #tpu.memory_space<vmem>>, vector<8x128xf32>
    tpu.vector_store %arg8[%66, %c0_26], %62 {strides = array<i32>} : memref<72x128xf32, #tpu.memory_space<vmem>>, vector<8x128xf32>,
    %c2_i32 = arith.constant 2 : i32
    %c8_i32_27 = arith.constant 8 : i32
    %68 = arith.muli %c2_i32, %c8_i32_27 : i32
    %69 = tpu.assume_multiple %68, 8 : i32
    %70 = arith.index_cast %69 : i32 to index
    %c0_28 = arith.constant 0 : index
    %71 = vector.load %arg7[%70, %c0_28] : memref<64x512xf32, #tpu.memory_space<vmem>>, vector<8x512xf32>
    %72 = vector.extract_strided_slice %71 {offsets = [0, 0], sizes = [8, 384], strides = [1, 1]} : vector<8x512xf32> to vector<8x384xf32>
    %cst_29 = arith.constant dense<0.000000e+00> : vector<8x384xf32>
    %73 = tpu.matmul %62, %7, %cst_29 {dimension_numbers = #tpu.dot_dimension_numbers<[1], [0], [0], [1], [0, 0, 1, 1], [], []>} : vector<8x128xf32>, vector<128x384xf32>, vector<8x384xf32> -> vector<8x384xf32>
    %74 = arith.addf %72, %73 : vector<8x384xf32>
    %75 = vector.extract_strided_slice %74 {offsets = [0, 0], sizes = [8, 128], strides = [1, 1]} : vector<8x384xf32> to vector<8x128xf32>
    %76 = arith.negf %75 : vector<8x128xf32>
    %77 = math.exp %76 : vector<8x128xf32>
    %cst_30 = arith.constant 1.000000e+00 : f32
    %78 = vector.broadcast %cst_30 : f32 to vector<8x128xf32>
    %79 = arith.addf %78, %77 : vector<8x128xf32>
    %80 = arith.divf %78, %79 : vector<8x128xf32>
    %81 = vector.extract_strided_slice %74 {offsets = [0, 128], sizes = [8, 128], strides = [1, 1]} : vector<8x384xf32> to vector<8x128xf32>
    %82 = arith.negf %81 : vector<8x128xf32>
    %83 = math.exp %82 : vector<8x128xf32>
    %cst_31 = arith.constant 1.000000e+00 : f32
    %84 = vector.broadcast %cst_31 : f32 to vector<8x128xf32>
    %85 = arith.addf %84, %83 : vector<8x128xf32>
    %86 = arith.divf %84, %85 : vector<8x128xf32>
    %87 = vector.extract_strided_slice %74 {offsets = [0, 256], sizes = [8, 128], strides = [1, 1]} : vector<8x384xf32> to vector<8x128xf32>
    %88 = math.tanh %87 : vector<8x128xf32>
    %89 = arith.mulf %80, %62 : vector<8x128xf32>
    %90 = arith.mulf %86, %88 : vector<8x128xf32>
    %91 = arith.addf %89, %90 : vector<8x128xf32>
    %c1_i32_32 = arith.constant 1 : i32
    %92 = arith.addi %c2_i32, %c1_i32_32 : i32
    %c8_i32_33 = arith.constant 8 : i32
    %93 = arith.muli %92, %c8_i32_33 : i32
    %94 = tpu.assume_multiple %93, 8 : i32
    %95 = arith.index_cast %94 : i32 to index
    %c0_34 = arith.constant 0 : index
    %96 = vector.load %arg8[%95, %c0_34] : memref<72x128xf32, #tpu.memory_space<vmem>>, vector<8x128xf32>
    tpu.vector_store %arg8[%95, %c0_34], %91 {strides = array<i32>} : memref<72x128xf32, #tpu.memory_space<vmem>>, vector<8x128xf32>,
    %c3_i32 = arith.constant 3 : i32
    %c8_i32_35 = arith.constant 8 : i32
    %97 = arith.muli %c3_i32, %c8_i32_35 : i32
    %98 = tpu.assume_multiple %97, 8 : i32
    %99 = arith.index_cast %98 : i32 to index
    %c0_36 = arith.constant 0 : index
    %100 = vector.load %arg7[%99, %c0_36] : memref<64x512xf32, #tpu.memory_space<vmem>>, vector<8x512xf32>
    %101 = vector.extract_strided_slice %100 {offsets = [0, 0], sizes = [8, 384], strides = [1, 1]} : vector<8x512xf32> to vector<8x384xf32>
    %cst_37 = arith.constant dense<0.000000e+00> : vector<8x384xf32>
    %102 = tpu.matmul %91, %7, %cst_37 {dimension_numbers = #tpu.dot_dimension_numbers<[1], [0], [0], [1], [0, 0, 1, 1], [], []>} : vector<8x128xf32>, vector<128x384xf32>, vector<8x384xf32> -> vector<8x384xf32>
    %103 = arith.addf %101, %102 : vector<8x384xf32>
    %104 = vector.extract_strided_slice %103 {offsets = [0, 0], sizes = [8, 128], strides = [1, 1]} : vector<8x384xf32> to vector<8x128xf32>
    %105 = arith.negf %104 : vector<8x128xf32>
    %106 = math.exp %105 : vector<8x128xf32>
    %cst_38 = arith.constant 1.000000e+00 : f32
    %107 = vector.broadcast %cst_38 : f32 to vector<8x128xf32>
    %108 = arith.addf %107, %106 : vector<8x128xf32>
    %109 = arith.divf %107, %108 : vector<8x128xf32>
    %110 = vector.extract_strided_slice %103 {offsets = [0, 128], sizes = [8, 128], strides = [1, 1]} : vector<8x384xf32> to vector<8x128xf32>
    %111 = arith.negf %110 : vector<8x128xf32>
    %112 = math.exp %111 : vector<8x128xf32>
    %cst_39 = arith.constant 1.000000e+00 : f32
    %113 = vector.broadcast %cst_39 : f32 to vector<8x128xf32>
    %114 = arith.addf %113, %112 : vector<8x128xf32>
    %115 = arith.divf %113, %114 : vector<8x128xf32>
    %116 = vector.extract_strided_slice %103 {offsets = [0, 256], sizes = [8, 128], strides = [1, 1]} : vector<8x384xf32> to vector<8x128xf32>
    %117 = math.tanh %116 : vector<8x128xf32>
    %118 = arith.mulf %109, %91 : vector<8x128xf32>
    %119 = arith.mulf %115, %117 : vector<8x128xf32>
    %120 = arith.addf %118, %119 : vector<8x128xf32>
    %c1_i32_40 = arith.constant 1 : i32
    %121 = arith.addi %c3_i32, %c1_i32_40 : i32
    %c8_i32_41 = arith.constant 8 : i32
    %122 = arith.muli %121, %c8_i32_41 : i32
    %123 = tpu.assume_multiple %122, 8 : i32
    %124 = arith.index_cast %123 : i32 to index
    %c0_42 = arith.constant 0 : index
    %125 = vector.load %arg8[%124, %c0_42] : memref<72x128xf32, #tpu.memory_space<vmem>>, vector<8x128xf32>
    tpu.vector_store %arg8[%124, %c0_42], %120 {strides = array<i32>} : memref<72x128xf32, #tpu.memory_space<vmem>>, vector<8x128xf32>,
    %c4_i32 = arith.constant 4 : i32
    %c8_i32_43 = arith.constant 8 : i32
    %126 = arith.muli %c4_i32, %c8_i32_43 : i32
    %127 = tpu.assume_multiple %126, 8 : i32
    %128 = arith.index_cast %127 : i32 to index
    %c0_44 = arith.constant 0 : index
    %129 = vector.load %arg7[%128, %c0_44] : memref<64x512xf32, #tpu.memory_space<vmem>>, vector<8x512xf32>
    %130 = vector.extract_strided_slice %129 {offsets = [0, 0], sizes = [8, 384], strides = [1, 1]} : vector<8x512xf32> to vector<8x384xf32>
    %cst_45 = arith.constant dense<0.000000e+00> : vector<8x384xf32>
    %131 = tpu.matmul %120, %7, %cst_45 {dimension_numbers = #tpu.dot_dimension_numbers<[1], [0], [0], [1], [0, 0, 1, 1], [], []>} : vector<8x128xf32>, vector<128x384xf32>, vector<8x384xf32> -> vector<8x384xf32>
    %132 = arith.addf %130, %131 : vector<8x384xf32>
    %133 = vector.extract_strided_slice %132 {offsets = [0, 0], sizes = [8, 128], strides = [1, 1]} : vector<8x384xf32> to vector<8x128xf32>
    %134 = arith.negf %133 : vector<8x128xf32>
    %135 = math.exp %134 : vector<8x128xf32>
    %cst_46 = arith.constant 1.000000e+00 : f32
    %136 = vector.broadcast %cst_46 : f32 to vector<8x128xf32>
    %137 = arith.addf %136, %135 : vector<8x128xf32>
    %138 = arith.divf %136, %137 : vector<8x128xf32>
    %139 = vector.extract_strided_slice %132 {offsets = [0, 128], sizes = [8, 128], strides = [1, 1]} : vector<8x384xf32> to vector<8x128xf32>
    %140 = arith.negf %139 : vector<8x128xf32>
    %141 = math.exp %140 : vector<8x128xf32>
    %cst_47 = arith.constant 1.000000e+00 : f32
    %142 = vector.broadcast %cst_47 : f32 to vector<8x128xf32>
    %143 = arith.addf %142, %141 : vector<8x128xf32>
    %144 = arith.divf %142, %143 : vector<8x128xf32>
    %145 = vector.extract_strided_slice %132 {offsets = [0, 256], sizes = [8, 128], strides = [1, 1]} : vector<8x384xf32> to vector<8x128xf32>
    %146 = math.tanh %145 : vector<8x128xf32>
    %147 = arith.mulf %138, %120 : vector<8x128xf32>
    %148 = arith.mulf %144, %146 : vector<8x128xf32>
    %149 = arith.addf %147, %148 : vector<8x128xf32>
    %c1_i32_48 = arith.constant 1 : i32
    %150 = arith.addi %c4_i32, %c1_i32_48 : i32
    %c8_i32_49 = arith.constant 8 : i32
    %151 = arith.muli %150, %c8_i32_49 : i32
    %152 = tpu.assume_multiple %151, 8 : i32
    %153 = arith.index_cast %152 : i32 to index
    %c0_50 = arith.constant 0 : index
    %154 = vector.load %arg8[%153, %c0_50] : memref<72x128xf32, #tpu.memory_space<vmem>>, vector<8x128xf32>
    tpu.vector_store %arg8[%153, %c0_50], %149 {strides = array<i32>} : memref<72x128xf32, #tpu.memory_space<vmem>>, vector<8x128xf32>,
    %c5_i32 = arith.constant 5 : i32
    %c8_i32_51 = arith.constant 8 : i32
    %155 = arith.muli %c5_i32, %c8_i32_51 : i32
    %156 = tpu.assume_multiple %155, 8 : i32
    %157 = arith.index_cast %156 : i32 to index
    %c0_52 = arith.constant 0 : index
    %158 = vector.load %arg7[%157, %c0_52] : memref<64x512xf32, #tpu.memory_space<vmem>>, vector<8x512xf32>
    %159 = vector.extract_strided_slice %158 {offsets = [0, 0], sizes = [8, 384], strides = [1, 1]} : vector<8x512xf32> to vector<8x384xf32>
    %cst_53 = arith.constant dense<0.000000e+00> : vector<8x384xf32>
    %160 = tpu.matmul %149, %7, %cst_53 {dimension_numbers = #tpu.dot_dimension_numbers<[1], [0], [0], [1], [0, 0, 1, 1], [], []>} : vector<8x128xf32>, vector<128x384xf32>, vector<8x384xf32> -> vector<8x384xf32>
    %161 = arith.addf %159, %160 : vector<8x384xf32>
    %162 = vector.extract_strided_slice %161 {offsets = [0, 0], sizes = [8, 128], strides = [1, 1]} : vector<8x384xf32> to vector<8x128xf32>
    %163 = arith.negf %162 : vector<8x128xf32>
    %164 = math.exp %163 : vector<8x128xf32>
    %cst_54 = arith.constant 1.000000e+00 : f32
    %165 = vector.broadcast %cst_54 : f32 to vector<8x128xf32>
    %166 = arith.addf %165, %164 : vector<8x128xf32>
    %167 = arith.divf %165, %166 : vector<8x128xf32>
    %168 = vector.extract_strided_slice %161 {offsets = [0, 128], sizes = [8, 128], strides = [1, 1]} : vector<8x384xf32> to vector<8x128xf32>
    %169 = arith.negf %168 : vector<8x128xf32>
    %170 = math.exp %169 : vector<8x128xf32>
    %cst_55 = arith.constant 1.000000e+00 : f32
    %171 = vector.broadcast %cst_55 : f32 to vector<8x128xf32>
    %172 = arith.addf %171, %170 : vector<8x128xf32>
    %173 = arith.divf %171, %172 : vector<8x128xf32>
    %174 = vector.extract_strided_slice %161 {offsets = [0, 256], sizes = [8, 128], strides = [1, 1]} : vector<8x384xf32> to vector<8x128xf32>
    %175 = math.tanh %174 : vector<8x128xf32>
    %176 = arith.mulf %167, %149 : vector<8x128xf32>
    %177 = arith.mulf %173, %175 : vector<8x128xf32>
    %178 = arith.addf %176, %177 : vector<8x128xf32>
    %c1_i32_56 = arith.constant 1 : i32
    %179 = arith.addi %c5_i32, %c1_i32_56 : i32
    %c8_i32_57 = arith.constant 8 : i32
    %180 = arith.muli %179, %c8_i32_57 : i32
    %181 = tpu.assume_multiple %180, 8 : i32
    %182 = arith.index_cast %181 : i32 to index
    %c0_58 = arith.constant 0 : index
    %183 = vector.load %arg8[%182, %c0_58] : memref<72x128xf32, #tpu.memory_space<vmem>>, vector<8x128xf32>
    tpu.vector_store %arg8[%182, %c0_58], %178 {strides = array<i32>} : memref<72x128xf32, #tpu.memory_space<vmem>>, vector<8x128xf32>,
    %c6_i32 = arith.constant 6 : i32
    %c8_i32_59 = arith.constant 8 : i32
    %184 = arith.muli %c6_i32, %c8_i32_59 : i32
    %185 = tpu.assume_multiple %184, 8 : i32
    %186 = arith.index_cast %185 : i32 to index
    %c0_60 = arith.constant 0 : index
    %187 = vector.load %arg7[%186, %c0_60] : memref<64x512xf32, #tpu.memory_space<vmem>>, vector<8x512xf32>
    %188 = vector.extract_strided_slice %187 {offsets = [0, 0], sizes = [8, 384], strides = [1, 1]} : vector<8x512xf32> to vector<8x384xf32>
    %cst_61 = arith.constant dense<0.000000e+00> : vector<8x384xf32>
    %189 = tpu.matmul %178, %7, %cst_61 {dimension_numbers = #tpu.dot_dimension_numbers<[1], [0], [0], [1], [0, 0, 1, 1], [], []>} : vector<8x128xf32>, vector<128x384xf32>, vector<8x384xf32> -> vector<8x384xf32>
    %190 = arith.addf %188, %189 : vector<8x384xf32>
    %191 = vector.extract_strided_slice %190 {offsets = [0, 0], sizes = [8, 128], strides = [1, 1]} : vector<8x384xf32> to vector<8x128xf32>
    %192 = arith.negf %191 : vector<8x128xf32>
    %193 = math.exp %192 : vector<8x128xf32>
    %cst_62 = arith.constant 1.000000e+00 : f32
    %194 = vector.broadcast %cst_62 : f32 to vector<8x128xf32>
    %195 = arith.addf %194, %193 : vector<8x128xf32>
    %196 = arith.divf %194, %195 : vector<8x128xf32>
    %197 = vector.extract_strided_slice %190 {offsets = [0, 128], sizes = [8, 128], strides = [1, 1]} : vector<8x384xf32> to vector<8x128xf32>
    %198 = arith.negf %197 : vector<8x128xf32>
    %199 = math.exp %198 : vector<8x128xf32>
    %cst_63 = arith.constant 1.000000e+00 : f32
    %200 = vector.broadcast %cst_63 : f32 to vector<8x128xf32>
    %201 = arith.addf %200, %199 : vector<8x128xf32>
    %202 = arith.divf %200, %201 : vector<8x128xf32>
    %203 = vector.extract_strided_slice %190 {offsets = [0, 256], sizes = [8, 128], strides = [1, 1]} : vector<8x384xf32> to vector<8x128xf32>
    %204 = math.tanh %203 : vector<8x128xf32>
    %205 = arith.mulf %196, %178 : vector<8x128xf32>
    %206 = arith.mulf %202, %204 : vector<8x128xf32>
    %207 = arith.addf %205, %206 : vector<8x128xf32>
    %c1_i32_64 = arith.constant 1 : i32
    %208 = arith.addi %c6_i32, %c1_i32_64 : i32
    %c8_i32_65 = arith.constant 8 : i32
    %209 = arith.muli %208, %c8_i32_65 : i32
    %210 = tpu.assume_multiple %209, 8 : i32
    %211 = arith.index_cast %210 : i32 to index
    %c0_66 = arith.constant 0 : index
    %212 = vector.load %arg8[%211, %c0_66] : memref<72x128xf32, #tpu.memory_space<vmem>>, vector<8x128xf32>
    tpu.vector_store %arg8[%211, %c0_66], %207 {strides = array<i32>} : memref<72x128xf32, #tpu.memory_space<vmem>>, vector<8x128xf32>,
    %c7_i32 = arith.constant 7 : i32
    %c8_i32_67 = arith.constant 8 : i32
    %213 = arith.muli %c7_i32, %c8_i32_67 : i32
    %214 = tpu.assume_multiple %213, 8 : i32
    %215 = arith.index_cast %214 : i32 to index
    %c0_68 = arith.constant 0 : index
    %216 = vector.load %arg7[%215, %c0_68] : memref<64x512xf32, #tpu.memory_space<vmem>>, vector<8x512xf32>
    %217 = vector.extract_strided_slice %216 {offsets = [0, 0], sizes = [8, 384], strides = [1, 1]} : vector<8x512xf32> to vector<8x384xf32>
    %cst_69 = arith.constant dense<0.000000e+00> : vector<8x384xf32>
    %218 = tpu.matmul %207, %7, %cst_69 {dimension_numbers = #tpu.dot_dimension_numbers<[1], [0], [0], [1], [0, 0, 1, 1], [], []>} : vector<8x128xf32>, vector<128x384xf32>, vector<8x384xf32> -> vector<8x384xf32>
    %219 = arith.addf %217, %218 : vector<8x384xf32>
    %220 = vector.extract_strided_slice %219 {offsets = [0, 0], sizes = [8, 128], strides = [1, 1]} : vector<8x384xf32> to vector<8x128xf32>
    %221 = arith.negf %220 : vector<8x128xf32>
    %222 = math.exp %221 : vector<8x128xf32>
    %cst_70 = arith.constant 1.000000e+00 : f32
    %223 = vector.broadcast %cst_70 : f32 to vector<8x128xf32>
    %224 = arith.addf %223, %222 : vector<8x128xf32>
    %225 = arith.divf %223, %224 : vector<8x128xf32>
    %226 = vector.extract_strided_slice %219 {offsets = [0, 128], sizes = [8, 128], strides = [1, 1]} : vector<8x384xf32> to vector<8x128xf32>
    %227 = arith.negf %226 : vector<8x128xf32>
    %228 = math.exp %227 : vector<8x128xf32>
    %cst_71 = arith.constant 1.000000e+00 : f32
    %229 = vector.broadcast %cst_71 : f32 to vector<8x128xf32>
    %230 = arith.addf %229, %228 : vector<8x128xf32>
    %231 = arith.divf %229, %230 : vector<8x128xf32>
    %232 = vector.extract_strided_slice %219 {offsets = [0, 256], sizes = [8, 128], strides = [1, 1]} : vector<8x384xf32> to vector<8x128xf32>
    %233 = math.tanh %232 : vector<8x128xf32>
    %234 = arith.mulf %225, %207 : vector<8x128xf32>
    %235 = arith.mulf %231, %233 : vector<8x128xf32>
    %236 = arith.addf %234, %235 : vector<8x128xf32>
    %c1_i32_72 = arith.constant 1 : i32
    %237 = arith.addi %c7_i32, %c1_i32_72 : i32
    %c8_i32_73 = arith.constant 8 : i32
    %238 = arith.muli %237, %c8_i32_73 : i32
    %239 = tpu.assume_multiple %238, 8 : i32
    %240 = arith.index_cast %239 : i32 to index
    %c0_74 = arith.constant 0 : index
    %241 = vector.load %arg8[%240, %c0_74] : memref<72x128xf32, #tpu.memory_space<vmem>>, vector<8x128xf32>
    tpu.vector_store %arg8[%240, %c0_74], %236 {strides = array<i32>} : memref<72x128xf32, #tpu.memory_space<vmem>>, vector<8x128xf32>,
    %c8_i32_75 = arith.constant 8 : i32
    %c0_76 = arith.constant 0 : index
    %c0_77 = arith.constant 0 : index
    %242 = vector.load %arg6[%c0_76, %c0_77] : memref<8x128xf32, #tpu.memory_space<vmem>>, vector<8x128xf32>
    tpu.vector_store %arg6[%c0_76, %c0_77], %236 {strides = array<i32>} : memref<8x128xf32, #tpu.memory_space<vmem>>, vector<8x128xf32>,
    %c0_78 = arith.constant 0 : index
    %c0_79 = arith.constant 0 : index
    %243 = vector.load %arg8[%c0_78, %c0_79] : memref<72x128xf32, #tpu.memory_space<vmem>>, vector<64x128xf32>
    %c8 = arith.constant 8 : index
    %c0_80 = arith.constant 0 : index
    %244 = vector.load %arg8[%c8, %c0_80] : memref<72x128xf32, #tpu.memory_space<vmem>>, vector<64x128xf32>
    %c0_81 = arith.constant 0 : index
    %c384 = arith.constant 384 : index
    %245 = vector.load %arg7[%c0_81, %c384] : memref<64x512xf32, #tpu.memory_space<vmem>>, vector<64x128xf32>
    %c0_82 = arith.constant 0 : index
    %c384_83 = arith.constant 384 : index
    %246 = vector.load %arg3[%c0_82, %c384_83] : memref<128x512xf32, #tpu.memory_space<vmem>>, vector<128x128xf32>
    %cst_84 = arith.constant dense<0.000000e+00> : vector<64x128xf32>
    %247 = tpu.matmul %243, %246, %cst_84 {dimension_numbers = #tpu.dot_dimension_numbers<[1], [0], [0], [1], [0, 0, 1, 1], [], []>} : vector<64x128xf32>, vector<128x128xf32>, vector<64x128xf32> -> vector<64x128xf32>
    %248 = arith.addf %245, %247 : vector<64x128xf32>
    %249 = math.tanh %244 : vector<64x128xf32>
    %250 = arith.negf %248 : vector<64x128xf32>
    %251 = math.exp %250 : vector<64x128xf32>
    %cst_85 = arith.constant 1.000000e+00 : f32
    %252 = vector.broadcast %cst_85 : f32 to vector<64x128xf32>
    %253 = arith.addf %252, %251 : vector<64x128xf32>
    %254 = arith.divf %252, %253 : vector<64x128xf32>
    %255 = arith.mulf %249, %254 : vector<64x128xf32>
    %c0_86 = arith.constant 0 : index
    %c0_87 = arith.constant 0 : index
    %256 = vector.load %arg5[%c0_86, %c0_87] : memref<64x128xf32, #tpu.memory_space<vmem>>, vector<64x128xf32>
    tpu.vector_store %arg5[%c0_86, %c0_87], %255 {strides = array<i32>} : memref<64x128xf32, #tpu.memory_space<vmem>>, vector<64x128xf32>,
    return
  }
  func.func @transform_0(%arg0: i32) -> (i32, i32) {
    %c0_i32 = arith.constant 0 : i32
    %c0_i32_0 = arith.constant 0 : i32
    %c0_i32_1 = arith.constant 0 : i32
    return %c0_i32, %c0_i32_0 : i32, i32
  }
  func.func @transform_1(%arg0: i32) -> (i32, i32) {
    %c0_i32 = arith.constant 0 : i32
    %c0_i32_0 = arith.constant 0 : i32
    %c0_i32_1 = arith.constant 0 : i32
    return %c0_i32, %c0_i32_0 : i32, i32
  }
  func.func @transform_2(%arg0: i32) -> (i32, i32) {
    %c0_i32 = arith.constant 0 : i32
    %c0_i32_0 = arith.constant 0 : i32
    %c0_i32_1 = arith.constant 0 : i32
    return %c0_i32, %c0_i32_0 : i32, i32
  }
  func.func @transform_3(%arg0: i32) -> (i32, i32) {
    %c0_i32 = arith.constant 0 : i32
    %c0_i32_0 = arith.constant 0 : i32
    %c0_i32_1 = arith.constant 0 : i32
    return %c0_i32, %c0_i32_0 : i32, i32
  }
  func.func @transform_4(%arg0: i32) -> (i32, i32) {
    %c0_i32 = arith.constant 0 : i32
    %c0_i32_0 = arith.constant 0 : i32
    %c0_i32_1 = arith.constant 0 : i32
    return %c0_i32, %c0_i32_0 : i32, i32
  }
  func.func @transform_5(%arg0: i32) -> (i32, i32) {
    %c0_i32 = arith.constant 0 : i32
    %c0_i32_0 = arith.constant 0 : i32
    %c0_i32_1 = arith.constant 0 : i32
    return %c0_i32, %c0_i32_0 : i32, i32
  }
}

</mosaic_0001>

<bundles_post_ra>
// kernel: tpu_custom_call.1
= control target key start
LH: loop header
LB: loop body
LE: loop exit
PB: predicated region body
PF: predicated region fallthrough
CT: control target
= control target key end

     0   :  { %11 = vsyncpa [#allocation5], 0  ;;  %s2854_s0 = inlined_call_operand.vmem [shape: f32[64,16], index: 0, kind: input, shape index: {}]   ;;  %s2855_s1 = inlined_call_operand.vmem [shape: f32[16,512], index: 1, kind: input, shape index: {}]   ;;  %s2856_s2 = inlined_call_operand.hbm [shape: f32[128,512], index: 2, kind: input, shape index: {}]   ;;  %s2857_s3 = inlined_call_operand.vmem [shape: f32[1,512], index: 3, kind: input, shape index: {}]   ;;  %s2858_s4 = inlined_call_operand.hbm [shape: f32[64,128], index: 4, kind: output, shape index: {0}]   ;;  %s2859_s5 = inlined_call_operand.hbm [shape: f32[8,128], index: 5, kind: output, shape index: {1}]  }
   0x1   :  { %12 = vsyncpa [#allocation6], 0 }
   0x2   :  { %13 = vsyncpa [#allocation9], 0  ;;  %s22_s20 = sshll.u32 %s2856_s2, 4  ;;  %s1867_s21 = smov [#allocation4]   ;;  %s23_s20 = int_to_ptr.hbm [resolvable:$true] %s22_s20 }
   0x3   :  { %s24_s22 = sshll.u32 %s1867_s21, 4  ;;  %s1868_s23 = smov 512   ;;  %s25_s22 = int_to_ptr.vmem [resolvable:$true] %s24_s22 }
   0x4   :  { %s1869_s24 = smov 32  }
   0x5   :  { %30 = dma.hbm_to_vmem [thread:$0]  %s23_s20, 8192, %s25_s22, [#allocation5], %s1868_s23, %s1868_s23, %s1869_s24  }
   0x6   :  { %1861 = dma.done.wait [#allocation5], 8192  }
   0x7   :  { %1862 = vsyncadd [#allocation5], 4294959104  ;;  %v49_v0 = vld [vmem:[%s2855_s1 + $0x20] sm:$0xff]  ;;  %v51_v1 = vld [vmem:[%s2855_s1 + $0x30] sm:$0xff]  ;;  %vm63_vm0 = vcmask 130048   ;;  %v2860_v62 = vmov 0.0  }
   0x8   :  { %v45_v2 = vld [vmem:[%s2855_s1] sm:$0xff]  ;;  %1601 = vmatpush.msra.mxu1 %v49_v0  ;;  %184 = vmatpush.msra.mxu2 %v51_v1  ;;  %v47_v3 = vld [vmem:[%s2855_s1 + $0x10] sm:$0xff]  ;;  %v50_v5 = vld [vmem:[%s2855_s1 + $0x28] sm:$0xff]  ;;  %s1523_s8 = sshll.u32 %s2859_s5, 4  ;;  %s1872_s5 = smov [#allocation7]   ;;  %s1524_s8 = int_to_ptr.hbm [resolvable:$true] %s1523_s8 }
   0x9   :  { %v1923_v4 = vld [vmem:[%s2854_s0 + $0x20] sm:$0xff]  ;;  %102 = vmatpush.msra.mxu0 %v49_v0  ;;  %1602 = vmatpush.msra.mxu3 %v49_v0  ;;  %v46_v8 = vld [vmem:[%s2855_s1 + $0x8] sm:$0xff]  ;;  %v2003_v24 = vld [vmem:[%s2854_s0 + $0x10] sm:$0xff]  ;;  %s1507_s9 = sshll.u32 %s1872_s5, 4  ;;  %s1509_s12 = sshll.u32 %s2858_s4, 4  ;;  %s1508_s9 = int_to_ptr.vmem [resolvable:$true] %s1507_s9  ;;  %s1510_s12 = int_to_ptr.hbm [resolvable:$true] %s1509_s12 }
   0xa   :  { %v1931_v6 = vld [vmem:[%s2854_s0] sm:$0xff]  ;;  %1603 = vmatpush.msra.mxu1 %v45_v2  ;;  %185 = vmatpush.msra.mxu2 %v47_v3  ;;  %v1945_v10 = vld [vmem:[#allocation4 + $0x1e8] sm:$0xff]  ;;  %v2028_v29 = vld [vmem:[%s2854_s0 + $0x30] sm:$0xff]  ;;  %s1873_s13 = smov 128   ;;  %s1874_s14 = smov 8  }
   0xb   :  { %v1933_v7 = vld [vmem:[#allocation4 + $0x1e0] sm:$0xff]  ;;  %1549 = vmatmul.msk.f32.vlgmr.msra.gmra.mxu1 %vm63_vm0, %v1923_v4  ;;  %1561 = vmatmul.msk.f32.vlgmr.msra.gmra.mxu2 %vm63_vm0, %v1931_v6  ;;  %v1950_v12 = vld [vmem:[#allocation4 + $0x1c8] sm:$0xff]  ;;  %v2047_v34 = vld [vmem:[%s2854_s0 + $0x18] sm:$0xff] }
   0xc   :  { %v1942_v9 = vld [vmem:[#allocation4 + $0x1c0] sm:$0xff]  ;;  %143 = vmatpush.msrb.mxu1 %v50_v5  ;;  %339 = vmatpush.msrb.mxu2 %v1933_v7  ;;  %v1960_v14 = vld [vmem:[%s2854_s0 + $0x8] sm:$0xff]  ;;  %v2071_v39 = vld [vmem:[%s2854_s0 + $0x38] sm:$0xff] }
   0xd   :  { %v1947_v11 = vld [vmem:[#allocation4 + $0x1a0] sm:$0xff]  ;;  %103 = vmatpush.msra.mxu0 %v45_v2  ;;  %1604 = vmatpush.msra.mxu3 %v45_v2  ;;  %v1965_v15 = vld [vmem:[#allocation4 + $0x1a8] sm:$0xff]  ;;  %v2090_v44 = vld [vmem:[#allocation4 + $0x1f0] sm:$0xff] }
   0xe   :  { %144 = vmatpush.msrb.mxu1 %v46_v8  ;;  %340 = vmatpush.msrb.mxu2 %v1942_v9  ;;  %v1953_v13 = vld [vmem:[#allocation4 + $0x180] sm:$0xff]  ;;  %v1977_v18 = vld [vmem:[#allocation4 + $0x188] sm:$0xff]  ;;  %v2099_v45 = vld [vmem:[#allocation4 + $0x1d0] sm:$0xff] }
   0xf   :  { %1545 = vmatmul.msk.f32.vlgmr.msra.gmra.mxu0 %vm63_vm0, %v1931_v6  ;;  %v1967_v16 = vld [vmem:[#allocation4 + $0x160] sm:$0xff]  ;;  %v1984_v19 = vld [vmem:[%s2854_s0 + $0x28] sm:$0xff]  ;;  %v2107_v48 = vld [vmem:[#allocation4 + $0x1b0] sm:$0xff] }
  0x10   :  { %359 = vmatpush.msra.mxu1 %v1945_v10  ;;  %341 = vmatpush.msrb.mxu2 %v1947_v11  ;;  %v1975_v17 = vld [vmem:[#allocation4 + $0x140] sm:$0xff]  ;;  %v1988_v21 = vld [vmem:[#allocation4 + $0x168] sm:$0xff]  ;;  %v2112_v49 = vld [vmem:[#allocation4 + $0x190] sm:$0xff] }
  0x11   :  { %472 = vmatpush.msrb.mxu0 %v1945_v10  ;;  %v1986_v20 = vld [vmem:[#allocation4 + $0x120] sm:$0xff]  ;;  %1550 = vmatmul.msk.f32.vlgmr.msra.gmra.mxu3 %vm63_vm0, %v1984_v19  ;;  %v1997_v23 = vld [vmem:[#allocation4 + $0x148] sm:$0xff]  ;;  %v2119_v50 = vld [vmem:[#allocation4 + $0x170] sm:$0xff] }
  0x12   :  { %360 = vmatpush.msra.mxu1 %v1950_v12  ;;  %342 = vmatpush.msrb.mxu2 %v1953_v13  ;;  %v1995_v22 = vld [vmem:[#allocation4 + $0x100] sm:$0xff]  ;;  %v2009_v26 = vld [vmem:[#allocation4 + $0x128] sm:$0xff]  ;;  %v2128_v51 = vld [vmem:[#allocation4 + $0x150] sm:$0xff] }
  0x13   :  { %473 = vmatpush.msrb.mxu0 %v1950_v12  ;;  %1553 = vmatmul.msk.f32.vlgmr.msrb.gmra.mxu1 %vm63_vm0, %v1931_v6  ;;  %v2007_v25 = vld [vmem:[#allocation4 + $0xe0] sm:$0xff]  ;;  %v2021_v28 = vld [vmem:[#allocation4 + $0x108] sm:$0xff]  ;;  %v2132_v52 = vld [vmem:[#allocation4 + $0x130] sm:$0xff] }
  0x14   :  { %1562 = vmatmul.msk.f32.gmra.mxu2 %vm63_vm0, %v1960_v14  ;;  %361 = vmatpush.msra.mxu1 %v1965_v15  ;;  %v2019_v27 = vld [vmem:[#allocation4 + $0xc0] sm:$0xff]  ;;  %v2032_v31 = vld [vmem:[#allocation4 + $0xe8] sm:$0xff]  ;;  %v2137_v53 = vld [vmem:[#allocation4 + $0x110] sm:$0xff] }
  0x15   :  { %343 = vmatpush.msrb.mxu2 %v1967_v16  ;;  %474 = vmatpush.msrb.mxu0 %v1965_v15  ;;  %v2030_v30 = vld [vmem:[#allocation4 + $0xa0] sm:$0xff]  ;;  %v2041_v33 = vld [vmem:[#allocation4 + $0xc8] sm:$0xff]  ;;  %v2142_v54 = vld [vmem:[#allocation4 + $0xf0] sm:$0xff] }
  0x16   :  { %362 = vmatpush.msra.mxu1 %v1977_v18  ;;  %v2039_v32 = vld [vmem:[#allocation4 + $0x80] sm:$0xff]  ;;  %v2053_v36 = vld [vmem:[#allocation4 + $0xa8] sm:$0xff]  ;;  %v2151_v55 = vld [vmem:[#allocation4 + $0xd0] sm:$0xff] }
  0x17   :  { %344 = vmatpush.msrb.mxu2 %v1975_v17  ;;  %475 = vmatpush.msrb.mxu0 %v1977_v18  ;;  %v2051_v35 = vld [vmem:[#allocation4 + $0x60] sm:$0xff]  ;;  %v2064_v38 = vld [vmem:[#allocation4 + $0x88] sm:$0xff]  ;;  %v2155_v56 = vld [vmem:[#allocation4 + $0xb0] sm:$0xff] }
  0x18   :  { %363 = vmatpush.msra.mxu1 %v1988_v21  ;;  %1546 = vmatmul.msk.f32.gmra.mxu0 %vm63_vm0, %v1960_v14  ;;  %v2062_v37 = vld [vmem:[#allocation4 + $0x40] sm:$0xff]  ;;  %v2075_v41 = vld [vmem:[#allocation4 + $0x68] sm:$0xff]  ;;  %v2160_v57 = vld [vmem:[#allocation4 + $0x90] sm:$0xff] }
  0x19   :  { %345 = vmatpush.msrb.mxu2 %v1986_v20  ;;  %1551 = vmatmul.msk.f32.gmra.mxu3 %vm63_vm0, %v2028_v29  ;;  %v2073_v40 = vld [vmem:[#allocation4 + $0x20] sm:$0xff]  ;;  %v2084_v43 = vld [vmem:[#allocation4 + $0x48] sm:$0xff]  ;;  %v2165_v58 = vld [vmem:[#allocation4 + $0x70] sm:$0xff] }
  0x1a   :  { %364 = vmatpush.msra.mxu1 %v1997_v23  ;;  %476 = vmatpush.msrb.mxu0 %v1988_v21  ;;  %2878 = vst [vmem:[#allocation13_spill] sm:$0xff] %v2073_v40  ;;  %v2082_v42 = vld [vmem:[#allocation4] sm:$0xff]  ;;  %v2101_v46 = vld [vmem:[#allocation4 + $0x28] sm:$0xff]  ;;  %v2174_v59 = vld [vmem:[#allocation4 + $0x50] sm:$0xff] }
  0x1b   :  { %346 = vmatpush.msrb.mxu2 %v1995_v22  ;;  %1554 = vmatmul.msk.f32.gmra.mxu1 %vm63_vm0, %v1960_v14  ;;  %2879 = vst [vmem:[#allocation14_spill] sm:$0xff] %v2082_v42  ;;  %v2105_v47 = vld [vmem:[#allocation4 + $0x8] sm:$0xff]  ;;  %v2178_v60 = vld [vmem:[#allocation4 + $0x30] sm:$0xff]  ;;  %v52_v63 = vld [vmem:[%s2855_s1 + $0x38] sm:$0xff] }
  0x1c   :  { %1563 = vmatmul.msk.f32.gmra.mxu2 %vm63_vm0, %v2003_v24  ;;  %365 = vmatpush.msra.mxu1 %v2009_v26  ;;  %2880 = vst [vmem:[#allocation15_spill] sm:$0xff] %v2101_v46  ;;  %v2183_v61 = vld [vmem:[#allocation4 + $0x10] sm:$0xff]  ;;  %v48_v0 = vld [vmem:[%s2855_s1 + $0x18] sm:$0xff]  ;;  %v2281_v5 = vld [vmem:[%s2857_s3] sm:$0xf]  ;;  %s1871_s3 = smov [#allocation8]  }
  0x1d   :  { %347 = vmatpush.msrb.mxu2 %v2007_v25  ;;  %477 = vmatpush.msrb.mxu0 %v1997_v23  ;;  %2881 = vst [vmem:[#allocation16_spill] sm:$0xff] %v2105_v47  ;;  %s1521_s2 = sshll.u32 %s1871_s3, 4  ;;  %s1522_s2 = int_to_ptr.vmem [resolvable:$true] %s1521_s2 }
  0x1e   :  { %366 = vmatpush.msra.mxu1 %v2021_v28  ;;  %2882 = vst [vmem:[#allocation17_spill] sm:$0xff] %v2178_v60  ;;  %225 = vmatpush.msrb.mxu3 %v52_v63  ;;  %v2289_v63 = vperm.slane %v2281_v5, 1 }
  0x1f   :  { %348 = vmatpush.msrb.mxu2 %v2019_v27  ;;  %478 = vmatpush.msrb.mxu0 %v2009_v26  ;;  %2883 = vst [vmem:[#allocation18_spill] sm:$0xff] %v2183_v61 }
  0x20   :  { %367 = vmatpush.msra.mxu1 %v2032_v31  ;;  %1547 = vmatmul.msk.f32.gmra.mxu0 %vm63_vm0, %v2003_v24  ;;  %2885 = vst [vmem:[#allocation20_spill] sm:$0xff] %v2281_v5 }
  0x21   :  { %349 = vmatpush.msrb.mxu2 %v2030_v30  ;;  %1552 = vmatmul.msk.f32.gmra.mxu3 %vm63_vm0, %v2071_v39 }
  0x22   :  { %368 = vmatpush.msra.mxu1 %v2041_v33  ;;  %479 = vmatpush.msrb.mxu0 %v2021_v28 }
  0x23   :  { %350 = vmatpush.msrb.mxu2 %v2039_v32  ;;  %1555 = vmatmul.msk.f32.gmra.mxu1 %vm63_vm0, %v2003_v24 }
  0x24   :  { %1564 = vmatmul.msk.f32.gmra.mxu2 %vm63_vm0, %v2047_v34  ;;  %369 = vmatpush.msra.mxu1 %v2053_v36 }
  0x25   :  { %351 = vmatpush.msrb.mxu2 %v2051_v35  ;;  %480 = vmatpush.msrb.mxu0 %v2032_v31 }
  0x26   :  { %370 = vmatpush.msra.mxu1 %v2064_v38  ;;  %226 = vmatpush.msrb.mxu3 %v48_v0 }
  0x27   :  { %352 = vmatpush.msrb.mxu2 %v2062_v37  ;;  %481 = vmatpush.msrb.mxu0 %v2041_v33 }
  0x28   :  { %371 = vmatpush.msra.mxu1 %v2075_v41  ;;  %1548 = vmatmul.msk.f32.gmra.mxu0 %vm63_vm0, %v2047_v34 }
  0x29   :  { %353 = vmatpush.msrb.mxu2 %v2073_v40  ;;  %482 = vmatpush.msrb.mxu0 %v2053_v36 }
  0x2a   :  { %372 = vmatpush.msra.mxu1 %v2084_v43  ;;  %1569 = vmatmul.msk.f32.vlgmr.msrb.gmra.mxu3 %vm63_vm0, %v1931_v6  ;;  %v2285_v6 = vperm.slane %v2281_v5, 2 }
  0x2b   :  { %354 = vmatpush.msrb.mxu2 %v2082_v42  ;;  %1556 = vmatmul.msk.f32.gmra.mxu1 %vm63_vm0, %v2047_v34 }
  0x2c   :  { %1565 = vmatmul.msk.f32.gmra.mxu2 %vm63_vm0, %v1923_v4  ;;  %373 = vmatpush.msra.mxu1 %v2101_v46 }
  0x2d   :  { %379 = vmatpush.msra.mxu2 %v2090_v44  ;;  %483 = vmatpush.msrb.mxu0 %v2064_v38 }
  0x2e   :  { %374 = vmatpush.msra.mxu1 %v2105_v47  ;;  %452 = vmatpush.msra.mxu3 %v1933_v7 }
  0x2f   :  { %380 = vmatpush.msra.mxu2 %v2099_v45  ;;  %484 = vmatpush.msrb.mxu0 %v2075_v41 }
  0x30   :  { %492 = vmatpush.msrb.mxu1 %v2090_v44  ;;  %453 = vmatpush.msra.mxu3 %v1942_v9 }
  0x31   :  { %381 = vmatpush.msra.mxu2 %v2107_v48  ;;  %485 = vmatpush.msrb.mxu0 %v2084_v43 }
  0x32   :  { %493 = vmatpush.msrb.mxu1 %v2099_v45  ;;  %454 = vmatpush.msra.mxu3 %v1947_v11 }
  0x33   :  { %382 = vmatpush.msra.mxu2 %v2112_v49  ;;  %1557 = vmatmul.msk.f32.gmra.mxu1 %vm63_vm0, %v1923_v4 }
  0x34   :  { %1566 = vmatmul.msk.f32.gmra.mxu2 %vm63_vm0, %v1984_v19  ;;  %494 = vmatpush.msrb.mxu1 %v2107_v48 }
  0x35   :  { %383 = vmatpush.msra.mxu2 %v2119_v50  ;;  %486 = vmatpush.msrb.mxu0 %v2101_v46 }
  0x36   :  { %495 = vmatpush.msrb.mxu1 %v2112_v49  ;;  %455 = vmatpush.msra.mxu3 %v1953_v13 }
  0x37   :  { %384 = vmatpush.msra.mxu2 %v2128_v51  ;;  %487 = vmatpush.msrb.mxu0 %v2105_v47 }
  0x38   :  { %496 = vmatpush.msrb.mxu1 %v2119_v50  ;;  %1570 = vmatmul.msk.f32.gmra.mxu3 %vm63_vm0, %v1960_v14 }
  0x39   :  { %385 = vmatpush.msra.mxu2 %v2132_v52  ;;  %605 = vmatpush.msra.mxu0 %v2090_v44 }
  0x3a   :  { %497 = vmatpush.msrb.mxu1 %v2128_v51  ;;  %456 = vmatpush.msra.mxu3 %v1967_v16 }
  0x3b   :  { %386 = vmatpush.msra.mxu2 %v2137_v53  ;;  %1558 = vmatmul.msk.f32.gmra.mxu1 %vm63_vm0, %v1984_v19 }
  0x3c   :  { %1567 = vmatmul.msk.f32.gmra.mxu2 %vm63_vm0, %v2028_v29  ;;  %498 = vmatpush.msrb.mxu1 %v2132_v52 }
  0x3d   :  { %387 = vmatpush.msra.mxu2 %v2142_v54  ;;  %606 = vmatpush.msra.mxu0 %v2099_v45 }
  0x3e   :  { %499 = vmatpush.msrb.mxu1 %v2137_v53  ;;  %457 = vmatpush.msra.mxu3 %v1975_v17 }
  0x3f   :  { %388 = vmatpush.msra.mxu2 %v2151_v55  ;;  %607 = vmatpush.msra.mxu0 %v2107_v48 }
  0x40   :  { %500 = vmatpush.msrb.mxu1 %v2142_v54  ;;  %458 = vmatpush.msra.mxu3 %v1986_v20 }
  0x41   :  { %389 = vmatpush.msra.mxu2 %v2155_v56  ;;  %608 = vmatpush.msra.mxu0 %v2112_v49 }
  0x42   :  { %501 = vmatpush.msrb.mxu1 %v2151_v55  ;;  %459 = vmatpush.msra.mxu3 %v1995_v22 }
  0x43   :  { %390 = vmatpush.msra.mxu2 %v2160_v57  ;;  %1559 = vmatmul.msk.f32.gmra.mxu1 %vm63_vm0, %v2028_v29 }
  0x44   :  { %1568 = vmatmul.msk.f32.gmra.mxu2 %vm63_vm0, %v2071_v39  ;;  %502 = vmatpush.msrb.mxu1 %v2155_v56 }
  0x45   :  { %391 = vmatpush.msra.mxu2 %v2165_v58  ;;  %609 = vmatpush.msra.mxu0 %v2119_v50 }
  0x46   :  { %503 = vmatpush.msrb.mxu1 %v2160_v57  ;;  %1571 = vmatmul.msk.f32.gmra.mxu3 %vm63_vm0, %v2003_v24 }
  0x47   :  { %392 = vmatpush.msra.mxu2 %v2174_v59  ;;  %610 = vmatpush.msra.mxu0 %v2128_v51 }
  0x48   :  { %504 = vmatpush.msrb.mxu1 %v2165_v58  ;;  %460 = vmatpush.msra.mxu3 %v2007_v25 }
  0x49   :  { %393 = vmatpush.msra.mxu2 %v2178_v60  ;;  %611 = vmatpush.msra.mxu0 %v2132_v52 }
  0x4a   :  { %505 = vmatpush.msrb.mxu1 %v2174_v59  ;;  %461 = vmatpush.msra.mxu3 %v2019_v27 }
  0x4b   :  { %394 = vmatpush.msra.mxu2 %v2183_v61  ;;  %1560 = vmatmul.msk.f32.gmra.mxu1 %vm63_vm0, %v2071_v39 }
  0x4c   :  { %355 = vmatmul.f32.vlgmr.msrb.gmra.mxu2 %v2860_v62  ;;  %506 = vmatpush.msrb.mxu1 %v2178_v60 }
  0x4d   :  { %565 = vmatpush.msrb.mxu2 %v1933_v7  ;;  %612 = vmatpush.msra.mxu0 %v2137_v53 }
  0x4e   :  { %507 = vmatpush.msrb.mxu1 %v2183_v61  ;;  %462 = vmatpush.msra.mxu3 %v2030_v30 }
  0x4f   :  { %566 = vmatpush.msrb.mxu2 %v1942_v9  ;;  %613 = vmatpush.msra.mxu0 %v2142_v54 }
  0x50   :  { %463 = vmatpush.msra.mxu3 %v2039_v32 }
  0x51   :  { %567 = vmatpush.msrb.mxu2 %v1947_v11  ;;  %614 = vmatpush.msra.mxu0 %v2151_v55 }
  0x52   :  { %1572 = vmatmul.msk.f32.gmra.mxu3 %vm63_vm0, %v2047_v34 }
  0x53   :  { %568 = vmatpush.msrb.mxu2 %v1953_v13  ;;  %375 = vmatmul.f32.vlgmr.msra.gmra.mxu1 %v2860_v62 }
  0x54   :  { %395 = vmatmul.f32.vlgmr.msra.gmra.mxu2 %v2860_v62  ;;  %678 = vmatpush.msra.mxu1 %v1933_v7 }
  0x55   :  { %569 = vmatpush.msrb.mxu2 %v1967_v16  ;;  %615 = vmatpush.msra.mxu0 %v2155_v56 }
  0x56   :  { %679 = vmatpush.msra.mxu1 %v1942_v9  ;;  %464 = vmatpush.msra.mxu3 %v2051_v35 }
  0x57   :  { %570 = vmatpush.msrb.mxu2 %v1975_v17  ;;  %616 = vmatpush.msra.mxu0 %v2160_v57 }
  0x58   :  { %680 = vmatpush.msra.mxu1 %v1947_v11  ;;  %465 = vmatpush.msra.mxu3 %v2062_v37 }
  0x59   :  { %571 = vmatpush.msrb.mxu2 %v1986_v20  ;;  %617 = vmatpush.msra.mxu0 %v2165_v58 }
  0x5a   :  { %681 = vmatpush.msra.mxu1 %v1953_v13  ;;  %466 = vmatpush.msra.mxu3 %v2073_v40 }
  0x5b   :  { %572 = vmatpush.msrb.mxu2 %v1995_v22  ;;  %618 = vmatpush.msra.mxu0 %v2174_v59 }
  0x5c   :  { %682 = vmatpush.msra.mxu1 %v1967_v16  ;;  %467 = vmatpush.msra.mxu3 %v2082_v42 }
  0x5d   :  { %573 = vmatpush.msrb.mxu2 %v2007_v25  ;;  %619 = vmatpush.msra.mxu0 %v2178_v60 }
  0x5e   :  { %683 = vmatpush.msra.mxu1 %v1975_v17  ;;  %1573 = vmatmul.msk.f32.gmra.mxu3 %vm63_vm0, %v1923_v4 }
  0x5f   :  { %574 = vmatpush.msrb.mxu2 %v2019_v27  ;;  %620 = vmatpush.msra.mxu0 %v2183_v61 }
  0x60   :  { %684 = vmatpush.msra.mxu1 %v1986_v20  ;;  %585 = vmatpush.msrb.mxu3 %v1945_v10 }
  0x61   :  { %575 = vmatpush.msrb.mxu2 %v2030_v30 }
  0x62   :  { %685 = vmatpush.msra.mxu1 %v1995_v22  ;;  %586 = vmatpush.msrb.mxu3 %v1950_v12 }
  0x63   :  { %576 = vmatpush.msrb.mxu2 %v2039_v32 }
  0x64   :  { %686 = vmatpush.msra.mxu1 %v2007_v25  ;;  %587 = vmatpush.msrb.mxu3 %v1965_v15 }
  0x65   :  { %577 = vmatpush.msrb.mxu2 %v2051_v35 }
  0x66   :  { %687 = vmatpush.msra.mxu1 %v2019_v27  ;;  %588 = vmatpush.msrb.mxu3 %v1977_v18 }
  0x67   :  { %578 = vmatpush.msrb.mxu2 %v2062_v37  ;;  %1574 = vmatmul.msk.f32.gmra.mxu3 %vm63_vm0, %v1984_v19 }
  0x68   :  { %688 = vmatpush.msra.mxu1 %v2030_v30  ;;  %589 = vmatpush.msrb.mxu3 %v1988_v21 }
  0x69   :  { %579 = vmatpush.msrb.mxu2 %v2073_v40 }
  0x6a   :  { %689 = vmatpush.msra.mxu1 %v2039_v32  ;;  %590 = vmatpush.msrb.mxu3 %v1997_v23 }
  0x6b   :  { %580 = vmatpush.msrb.mxu2 %v2082_v42 }
  0x6c   :  { %690 = vmatpush.msra.mxu1 %v2051_v35  ;;  %591 = vmatpush.msrb.mxu3 %v2009_v26 }
  0x6d   :  { %698 = vmatpush.msra.mxu2 %v1945_v10 }
  0x6e   :  { %691 = vmatpush.msra.mxu1 %v2062_v37  ;;  %592 = vmatpush.msrb.mxu3 %v2021_v28 }
  0x6f   :  { %699 = vmatpush.msra.mxu2 %v1950_v12  ;;  %1575 = vmatmul.msk.f32.gmra.mxu3 %vm63_vm0, %v2028_v29 }
  0x70   :  { %692 = vmatpush.msra.mxu1 %v2073_v40  ;;  %593 = vmatpush.msrb.mxu3 %v2032_v31 }
  0x71   :  { %700 = vmatpush.msra.mxu2 %v1965_v15 }
  0x72   :  { %693 = vmatpush.msra.mxu1 %v2082_v42  ;;  %594 = vmatpush.msrb.mxu3 %v2041_v33 }
  0x73   :  { %701 = vmatpush.msra.mxu2 %v1977_v18 }
  0x74   :  { %595 = vmatpush.msrb.mxu3 %v2053_v36 }
  0x75   :  { %702 = vmatpush.msra.mxu2 %v1988_v21 }
  0x76   :  { %596 = vmatpush.msrb.mxu3 %v2064_v38 }
  0x77   :  { %703 = vmatpush.msra.mxu2 %v1997_v23  ;;  %1576 = vmatmul.msk.f32.gmra.mxu3 %vm63_vm0, %v2071_v39 }
  0x78   :  { %597 = vmatpush.msrb.mxu3 %v2075_v41 }
  0x79   :  { %704 = vmatpush.msra.mxu2 %v2009_v26 }
  0x7a   :  { %598 = vmatpush.msrb.mxu3 %v2084_v43 }
  0x7b   :  { %705 = vmatpush.msra.mxu2 %v2021_v28 }
  0x7c   :  { %599 = vmatpush.msrb.mxu3 %v2101_v46 }
  0x7d   :  { %706 = vmatpush.msra.mxu2 %v2032_v31 }
  0x7e   :  { %600 = vmatpush.msrb.mxu3 %v2105_v47 }
  0x7f   :  { %707 = vmatpush.msra.mxu2 %v2041_v33 }
  0x81   :  { %708 = vmatpush.msra.mxu2 %v2053_v36 }
  0x83   :  { %709 = vmatpush.msra.mxu2 %v2064_v38 }
  0x85   :  { %710 = vmatpush.msra.mxu2 %v2075_v41 }
  0x87   :  { %711 = vmatpush.msra.mxu2 %v2084_v43 }
  0x88   :  { %v2262_v1 = vpop.f32.mrf.mxu1 }
  0x89   :  { %712 = vmatpush.msra.mxu2 %v2101_v46  ;;  %2884 = vst [vmem:[#allocation19_spill] sm:$0xff] %v2262_v1 }
  0x8b   :  { %713 = vmatpush.msra.mxu2 %v2105_v47 }
  0x8e   :  { %v2269_v2 = vpop.f32.mrf.mxu2 }
  0x90   :  { %v2272_v3 = vpop.f32.mrf.mxu1 }
  0x97   :  { %v190_v8 = vpop.f32.mrf.mxu2 }
  0x98   :  { %v2292_v14 = vadd.f32 %v190_v8, %v2285_v6  ;;  %v149_v0 = vpop.f32.mrf.mxu1 }
  0x99   :  { %v2296_v62 = vadd.f32 %v149_v0, %v2289_v63 }
  0x9a   :  { %2886 = vst [vmem:[#allocation21_spill] sm:$0xff] %v2292_v14 }
  0x9b   :  { %2887 = vst [vmem:[#allocation22_spill] sm:$0xff] %v2296_v62 }
  0x9f   :  { %v193_v1 = vpop.f32.mrf.mxu2 }
  0xa0   :  { %v2304_v61 = vadd.f32 %v193_v1, %v2285_v6  ;;  %v152_v8 = vpop.f32.mrf.mxu1 }
  0xa1   :  { %v2308_v14 = vadd.f32 %v152_v8, %v2289_v63 }
  0xa2   :  { %2888 = vst [vmem:[#allocation23_spill] sm:$0xff] %v2304_v61 }
  0xa3   :  { %2889 = vst [vmem:[#allocation24_spill] sm:$0xff] %v2308_v14 }
  0xa7   :  { %v196_v24 = vpop.f32.mrf.mxu2 }
  0xa8   :  { %v2316_v0 = vadd.f32 %v196_v24, %v2285_v6  ;;  %v155_v1 = vpop.f32.mrf.mxu1 }
  0xa9   :  { %v2320_v61 = vadd.f32 %v155_v1, %v2289_v63 }
  0xaa   :  { %2890 = vst [vmem:[#allocation25_spill] sm:$0xff] %v2316_v0 }
  0xab   :  { %2891 = vst [vmem:[#allocation26_spill] sm:$0xff] %v2320_v61 }
  0xaf   :  { %v199_v34 = vpop.f32.mrf.mxu2 }
  0xb0   :  { %v2328_v8 = vadd.f32 %v199_v34, %v2285_v6  ;;  %v158_v24 = vpop.f32.mrf.mxu1 }
  0xb1   :  { %v2332_v0 = vadd.f32 %v158_v24, %v2289_v63 }
  0xb2   :  { %2892 = vst [vmem:[#allocation27_spill] sm:$0xff] %v2328_v8 }
  0xb3   :  { %2893 = vst [vmem:[#allocation28_spill] sm:$0xff] %v2332_v0  ;;  %v147_v0 = vadd.f32 %v2272_v3, %v2289_v63 }
  0xb7   :  { %v202_v4 = vpop.f32.mrf.mxu2 }
  0xb8   :  { %v2340_v1 = vadd.f32 %v202_v4, %v2285_v6  ;;  %v161_v34 = vpop.f32.mrf.mxu1 }
  0xb9   :  { %v2344_v8 = vadd.f32 %v161_v34, %v2289_v63 }
  0xba   :  { %2894 = vst [vmem:[#allocation29_spill] sm:$0xff] %v2340_v1 }
  0xbb   :  { %2895 = vst [vmem:[#allocation30_spill] sm:$0xff] %v2344_v8 }
  0xbf   :  { %v205_v19 = vpop.f32.mrf.mxu2 }
  0xc0   :  { %v2352_v24 = vadd.f32 %v205_v19, %v2285_v6  ;;  %v164_v4 = vpop.f32.mrf.mxu1 }
  0xc1   :  { %v2356_v1 = vadd.f32 %v164_v4, %v2289_v63  ;;  %v2368_v4 = vperm.slane %v2281_v5, 0 }
  0xc2   :  { %2896 = vst [vmem:[#allocation31_spill] sm:$0xff] %v2352_v24  ;;  %v105_v24 = vpop.f32.mrf.mxu0 }
  0xc3   :  { %2897 = vst [vmem:[#allocation32_spill] sm:$0xff] %v2356_v1  ;;  %v106_v39 = vadd.f32 %v105_v24, %v2368_v4  ;;  %v188_v24 = vadd.f32 %v2269_v2, %v2285_v6 }
  0xc4   :  { %2899 = vst [vmem:[#allocation34_spill] sm:$0xff] %v2368_v4 }
  0xc7   :  { %v208_v29 = vpop.f32.mrf.mxu2 }
  0xc8   :  { %v2364_v34 = vadd.f32 %v208_v29, %v2285_v6  ;;  %v167_v19 = vpop.f32.mrf.mxu1 }
  0xc9   :  { %v2371_v1 = vadd.f32 %v167_v19, %v2289_v63 }
  0xca   :  { %2898 = vst [vmem:[#allocation33_spill] sm:$0xff] %v2364_v34 }
  0xcb   :  { %2900 = vst [vmem:[#allocation35_spill] sm:$0xff] %v2371_v1 }
  0xcf   :  { %v356_v8 = vpop.f32.mrf.mxu2 }
  0xd0   :  { %v399_v61 = vadd.f32 %v356_v8, %v106_v39  ;;  %v376_v14 = vpop.f32.mrf.mxu1 }
  0xd1   :  { %v400_v34 = vadd.f32 %v376_v14, %v147_v0 }
  0xd2   :  { %v1577_v29 = vmul.f32 -1.442695, %v399_v61 }
  0xd3   :  { %v1578_v62 = vmul.f32 -1.442695, %v400_v34 }
  0xd4   :  { %1613 = vpow2.f32 %v1577_v29 }
  0xd5   :  { %1615 = vpow2.f32 %v1578_v62 }
  0xd7   :  { %v396_v19 = vpop.f32.mrf.mxu2 }
  0xd8   :  { %v401_v63 = vadd.f32 %v396_v19, %v188_v24 }
  0xda   :  { %v1614_v47 = vpop.eup %1613 }
  0xdb   :  { %v405_v42 = vadd.f32 1.0, %v1614_v47  ;;  %v1616_v5 = vpop.eup %1615 }
  0xdc   :  { %v424_v46 = vadd.f32 1.0, %v1616_v5 }
  0xdd   :  { %1617 = vrcp.f32 %v405_v42  ;;  %v417_v14 = vand.u32 2147483648, %v405_v42  ;;  %v415_v62 = vand.u32 2147483647, %v405_v42  ;;  %vm411_vm2 = vweird.f32 %v405_v42 }
  0xde   :  { %1619 = vrcp.f32 %v424_v46  ;;  %v436_v47 = vand.u32 2147483648, %v424_v46  ;;  %v434_v29 = vand.u32 2147483647, %v424_v46  ;;  %vm430_vm6 = vweird.f32 %v424_v46 }
  0xdf   :  { %1621 = vtanh.f32 %v401_v63  ;;  %v418_v40 = vor.u32 1.1754944e-38, %v417_v14  ;;  %vm416_vm5 = vcmp.eq.f32.partialorder %v415_v62, 8.507059e+37  ;;  %v2906_v14 = vld [vmem:[#allocation15_spill] sm:$0xff]  ;;  %v2907_v62 = vld [vmem:[#allocation18_spill] sm:$0xff] }
  0xe0   :  { %v437_v19 = vor.u32 1.1754944e-38, %v436_v47  ;;  %vm435_vm8 = vcmp.eq.f32.partialorder %v434_v29, 8.507059e+37  ;;  %v2908_v47 = vld [vmem:[#allocation14_spill] sm:$0xff] }
  0xe3   :  { %v1618_v1 = vpop.eup %1617 }
  0xe4   :  { %v407_v4 = vmul.f32 %v1618_v1, %v405_v42  ;;  %v1620_v3 = vpop.eup %1619  ;;  %vm412_vm1 = vweird.f32 %v1618_v1  ;;  %v2378_v42 = vpop.f32.mrf.mxu3 }
  0xe5   :  { %v426_v61 = vmul.f32 %v1620_v3, %v424_v46  ;;  %vm431_vm3 = vweird.f32 %v1620_v3  ;;  %vm413_vm4 = vmor %vm411_vm2, %vm412_vm1  ;;  %2901 = vst [vmem:[#allocation36_spill] sm:$0xff] %v2378_v42 }
  0xe6   :  { %v408_v8 = vsub.f32 1.0, %v407_v4  ;;  %vm432_vm7 = vmor %vm430_vm6, %vm431_vm3 }
  0xe7   :  { %v427_v34 = vsub.f32 1.0, %v426_v61 }
  0xe8   :  { %v409_v0 = vmul.f32 %v1618_v1, %v408_v8  ;;  %v1622_v8 = vpop.eup %1621 }
  0xe9   :  { %v428_v39 = vmul.f32 %v1620_v3, %v427_v34 }
  0xea   :  { %v410_v5 = vadd.f32 %v1618_v1, %v409_v0 }
  0xeb   :  { %v429_v6 = vadd.f32 %v1620_v3, %v428_v39 }
  0xec   :  { %v414_v2 = vsel %vm413_vm4, %v1618_v1, %v410_v5  ;;  %v2909_v5 = vld [vmem:[#allocation16_spill] sm:$0xff] }
  0xed   :  { %v419_v4 = vsel %vm416_vm5, %v418_v40, %v414_v2  ;;  %v433_v24 = vsel %vm432_vm7, %v1620_v3, %v429_v6  ;;  %v2391_v40 = vpop.f32.mrf.mxu3  ;;  %v2905_v3 = vld [vmem:[#allocation13_spill] sm:$0xff] }
  0xee   :  { %v438_v61 = vsel %vm435_vm8, %v437_v19, %v433_v24  ;;  %v441_v63 = vmul.f32 0.0, %v419_v4  ;;  %2902 = vst [vmem:[#allocation37_spill] sm:$0xff] %v2391_v40  ;;  %v2916_v24 = vld [vmem:[#allocation20_spill] sm:$0xff]  ;;  %v2922_v40 = vld [vmem:[#allocation34_spill] sm:$0xff] }
  0xef   :  { %v442_v0 = vmul.f32 %v1622_v8, %v438_v61  ;;  %v2452_v8 = vperm.slane %v2916_v24, 3 }
  0xf1   :  { %v2380_v34 = vadd.f32 %v442_v0, %v441_v63  ;;  %2917 = vst [vmem:[#allocation20_spill] sm:$0xff] %v2452_v8  ;;  %v108_v0 = vpop.f32.mrf.mxu0 }
  0xf3   :  { %468 = vmatmul.f32.vlgmr.msra.gmra.mxu3 %v2380_v34  ;;  %488 = vmatmul.f32.vlgmr.msrb.gmra.mxu0 %v2380_v34 }
  0xf4   :  { %508 = vmatmul.f32.vlgmr.msrb.gmra.mxu1 %v2380_v34  ;;  %718 = vmatpush.msra.mxu3 %v2090_v44 }
  0xf5   :  { %791 = vmatpush.msrb.mxu0 %v1933_v7  ;;  %811 = vmatpush.msrb.mxu1 %v1945_v10  ;;  %v2408_v46 = vpop.f32.mrf.mxu3 }
  0xf6   :  { %719 = vmatpush.msra.mxu3 %v2099_v45  ;;  %2903 = vst [vmem:[#allocation38_spill] sm:$0xff] %v2408_v46 }
  0xf7   :  { %792 = vmatpush.msrb.mxu0 %v1942_v9  ;;  %812 = vmatpush.msrb.mxu1 %v1950_v12 }
  0xf8   :  { %720 = vmatpush.msra.mxu3 %v2107_v48 }
  0xf9   :  { %793 = vmatpush.msrb.mxu0 %v1947_v11  ;;  %813 = vmatpush.msrb.mxu1 %v1965_v15  ;;  %v2457_v46 = vpop.f32.mrf.mxu0 }
  0xfa   :  { %721 = vmatpush.msra.mxu3 %v2112_v49  ;;  %2919 = vst [vmem:[#allocation47_spill] sm:$0xff] %v2457_v46 }
  0xfb   :  { %794 = vmatpush.msrb.mxu0 %v1953_v13  ;;  %814 = vmatpush.msrb.mxu1 %v1977_v18 }
  0xfc   :  { %722 = vmatpush.msra.mxu3 %v2119_v50 }
  0xfd   :  { %795 = vmatpush.msrb.mxu0 %v1967_v16  ;;  %815 = vmatpush.msrb.mxu1 %v1988_v21  ;;  %v2425_v1 = vpop.f32.mrf.mxu3 }
  0xfe   :  { %723 = vmatpush.msra.mxu3 %v2128_v51  ;;  %2904 = vst [vmem:[#allocation39_spill] sm:$0xff] %v2425_v1 }
  0xff   :  { %796 = vmatpush.msrb.mxu0 %v1975_v17  ;;  %816 = vmatpush.msrb.mxu1 %v1997_v23 }
 0x100   :  { %724 = vmatpush.msra.mxu3 %v2132_v52 }
 0x101   :  { %797 = vmatpush.msrb.mxu0 %v1986_v20  ;;  %817 = vmatpush.msrb.mxu1 %v2009_v26 }
 0x102   :  { %725 = vmatpush.msra.mxu3 %v2137_v53 }
 0x103   :  { %798 = vmatpush.msrb.mxu0 %v1995_v22  ;;  %818 = vmatpush.msrb.mxu1 %v2021_v28 }
 0x104   :  { %726 = vmatpush.msra.mxu3 %v2142_v54 }
 0x105   :  { %799 = vmatpush.msrb.mxu0 %v2007_v25  ;;  %819 = vmatpush.msrb.mxu1 %v2032_v31  ;;  %v2439_v39 = vpop.f32.mrf.mxu3 }
 0x106   :  { %727 = vmatpush.msra.mxu3 %v2151_v55  ;;  %2910 = vst [vmem:[#allocation40_spill] sm:$0xff] %v2439_v39  ;;  %v2459_v39 = vpop.f32.mrf.mxu0 }
 0x107   :  { %800 = vmatpush.msrb.mxu0 %v2019_v27  ;;  %820 = vmatpush.msrb.mxu1 %v2041_v33  ;;  %2920 = vst [vmem:[#allocation48_spill] sm:$0xff] %v2459_v39 }
 0x108   :  { %728 = vmatpush.msra.mxu3 %v2155_v56 }
 0x109   :  { %801 = vmatpush.msrb.mxu0 %v2030_v30  ;;  %821 = vmatpush.msrb.mxu1 %v2053_v36 }
 0x10a   :  { %729 = vmatpush.msra.mxu3 %v2160_v57 }
 0x10b   :  { %802 = vmatpush.msrb.mxu0 %v2039_v32  ;;  %822 = vmatpush.msrb.mxu1 %v2064_v38 }
 0x10c   :  { %730 = vmatpush.msra.mxu3 %v2165_v58 }
 0x10d   :  { %803 = vmatpush.msrb.mxu0 %v2051_v35  ;;  %823 = vmatpush.msrb.mxu1 %v2075_v41  ;;  %v2441_v29 = vpop.f32.mrf.mxu3 }
 0x10e   :  { %731 = vmatpush.msra.mxu3 %v2174_v59  ;;  %2911 = vst [vmem:[#allocation41_spill] sm:$0xff] %v2441_v29 }
 0x10f   :  { %804 = vmatpush.msrb.mxu0 %v2062_v37  ;;  %824 = vmatpush.msrb.mxu1 %v2084_v43 }
 0x110   :  { %732 = vmatpush.msra.mxu3 %v2178_v60 }
 0x111   :  { %805 = vmatpush.msrb.mxu0 %v2905_v3  ;;  %825 = vmatpush.msrb.mxu1 %v2906_v14 }
 0x112   :  { %733 = vmatpush.msra.mxu3 %v2907_v62  ;;  %v2923_v62 = vld [vmem:[#allocation21_spill] sm:$0xff] }
 0x113   :  { %806 = vmatpush.msrb.mxu0 %v2908_v47  ;;  %826 = vmatpush.msrb.mxu1 %v2909_v5 }
 0x115   :  { %v2443_v2 = vpop.f32.mrf.mxu3 }
 0x116   :  { %2912 = vst [vmem:[#allocation42_spill] sm:$0xff] %v2443_v2  ;;  %v2921_v2 = vld [vmem:[#allocation22_spill] sm:$0xff] }
 0x11d   :  { %v2445_v6 = vpop.f32.mrf.mxu3 }
 0x11e   :  { %2913 = vst [vmem:[#allocation43_spill] sm:$0xff] %v2445_v6 }
 0x125   :  { %v2447_v4 = vpop.f32.mrf.mxu3 }
 0x126   :  { %2914 = vst [vmem:[#allocation44_spill] sm:$0xff] %v2447_v4  ;;  %v109_v4 = vadd.f32 %v108_v0, %v2922_v40 }
 0x12d   :  { %v2449_v19 = vpop.f32.mrf.mxu3 }
 0x12e   :  { %2915 = vst [vmem:[#allocation45_spill] sm:$0xff] %v2449_v19 }
 0x135   :  { %v249_v61 = vpop.f32.mrf.mxu3 }
 0x136   :  { %v2455_v63 = vadd.f32 %v249_v61, %v2452_v8 }
 0x138   :  { %2918 = vst [vmem:[#allocation46_spill] sm:$0xff] %v2455_v63 }
 0x170   :  { %v489_v29 = vpop.f32.mrf.mxu0 }
 0x171   :  { %v513_v1 = vadd.f32 %v489_v29, %v2921_v2  ;;  %v509_v63 = vpop.f32.mrf.mxu1 }
 0x172   :  { %v514_v39 = vadd.f32 %v509_v63, %v2923_v62 }
 0x173   :  { %v1580_v6 = vmul.f32 -1.442695, %v513_v1 }
 0x175   :  { %1623 = vpow2.f32 %v1580_v6 }
 0x176   :  { %v469_v19 = vpop.f32.mrf.mxu3 }
 0x177   :  { %v512_v42 = vadd.f32 %v469_v19, %v109_v4 }
 0x179   :  { %v1579_v24 = vmul.f32 -1.442695, %v512_v42 }
 0x17b   :  { %v1624_v5 = vpop.eup %1623  ;;  %1625 = vpow2.f32 %v1579_v24 }
 0x17c   :  { %v537_v47 = vadd.f32 1.0, %v1624_v5 }
 0x17e   :  { %1627 = vrcp.f32 %v537_v47  ;;  %v549_v1 = vand.u32 2147483648, %v537_v47  ;;  %v547_v6 = vand.u32 2147483647, %v537_v47  ;;  %vm543_vm10 = vweird.f32 %v537_v47 }
 0x180   :  { %v550_v5 = vor.u32 1.1754944e-38, %v549_v1  ;;  %vm548_vm12 = vcmp.eq.f32.partialorder %v547_v6, 8.507059e+37 }
 0x181   :  { %v1626_v61 = vpop.eup %1625 }
 0x182   :  { %v518_v8 = vadd.f32 1.0, %v1626_v61 }
 0x184   :  { %v1628_v46 = vpop.eup %1627  ;;  %1629 = vrcp.f32 %v518_v8  ;;  %v530_v62 = vand.u32 2147483648, %v518_v8  ;;  %vm524_vm14 = vweird.f32 %v518_v8 }
 0x185   :  { %v539_v14 = vmul.f32 %v1628_v46, %v537_v47  ;;  %1631 = vtanh.f32 %v514_v39  ;;  %vm544_vm9 = vweird.f32 %v1628_v46 }
 0x186   :  { %vm545_vm11 = vmor %vm543_vm10, %vm544_vm9 }
 0x187   :  { %v540_v29 = vsub.f32 1.0, %v539_v14  ;;  %v528_v14 = vand.u32 2147483647, %v518_v8 }
 0x189   :  { %v541_v2 = vmul.f32 %v1628_v46, %v540_v29  ;;  %v531_v29 = vor.u32 1.1754944e-38, %v530_v62  ;;  %vm529_vm0 = vcmp.eq.f32.partialorder %v528_v14, 8.507059e+37 }
 0x18a   :  { %v1630_v4 = vpop.eup %1629 }
 0x18b   :  { %v542_v42 = vadd.f32 %v1628_v46, %v541_v2  ;;  %v520_v19 = vmul.f32 %v1630_v4, %v518_v8  ;;  %v1632_v61 = vpop.eup %1631  ;;  %vm525_vm13 = vweird.f32 %v1630_v4 }
 0x18c   :  { %vm526_vm15 = vmor %vm524_vm14, %vm525_vm13 }
 0x18d   :  { %v546_v0 = vsel %vm545_vm11, %v1628_v46, %v542_v42  ;;  %v521_v24 = vsub.f32 1.0, %v520_v19 }
 0x18e   :  { %v551_v40 = vsel %vm548_vm12, %v550_v5, %v546_v0 }
 0x18f   :  { %v555_v63 = vmul.f32 %v1632_v61, %v551_v40  ;;  %v522_v3 = vmul.f32 %v1630_v4, %v521_v24 }
 0x191   :  { %v523_v39 = vadd.f32 %v1630_v4, %v522_v3 }
 0x193   :  { %v527_v60 = vsel %vm526_vm15, %v1630_v4, %v523_v39 }
 0x194   :  { %v532_v47 = vsel %vm529_vm0, %v531_v29, %v527_v60 }
 0x195   :  { %v554_v2 = vmul.f32 %v532_v47, %v2380_v34 }
 0x197   :  { %v2465_v1 = vadd.f32 %v555_v63, %v554_v2  ;;  %v2529_v2 = vld [vmem:[#allocation4 + $0x1e0] sm:$0xff] }
 0x199   :  { %581 = vmatmul.f32.vlgmr.msrb.gmra.mxu2 %v2465_v1  ;;  %601 = vmatmul.f32.vlgmr.msrb.gmra.mxu3 %v2465_v1 }
 0x19a   :  { %621 = vmatmul.f32.vlgmr.msra.gmra.mxu0 %v2465_v1  ;;  %831 = vmatpush.msrb.mxu2 %v2090_v44 }
 0x19b   :  { %904 = vmatpush.msrb.mxu3 %v1933_v7  ;;  %924 = vmatpush.msra.mxu0 %v1945_v10  ;;  %v2924_v7 = vld [vmem:[#allocation17_spill] sm:$0xff]  ;;  %v2926_v10 = vld [vmem:[#allocation15_spill] sm:$0xff] }
 0x19c   :  { %832 = vmatpush.msrb.mxu2 %v2099_v45 }
 0x19d   :  { %905 = vmatpush.msrb.mxu3 %v1942_v9  ;;  %925 = vmatpush.msra.mxu0 %v1950_v12  ;;  %v2925_v9 = vld [vmem:[#allocation13_spill] sm:$0xff]  ;;  %v2928_v12 = vld [vmem:[#allocation14_spill] sm:$0xff] }
 0x19e   :  { %833 = vmatpush.msrb.mxu2 %v2107_v48 }
 0x19f   :  { %906 = vmatpush.msrb.mxu3 %v1947_v11  ;;  %926 = vmatpush.msra.mxu0 %v1965_v15  ;;  %v2927_v11 = vld [vmem:[#allocation18_spill] sm:$0xff] }
 0x1a0   :  { %834 = vmatpush.msrb.mxu2 %v2112_v49  ;;  %v2930_v15 = vld [vmem:[#allocation34_spill] sm:$0xff] }
 0x1a1   :  { %907 = vmatpush.msrb.mxu3 %v1953_v13  ;;  %927 = vmatpush.msra.mxu0 %v1977_v18  ;;  %v2929_v13 = vld [vmem:[#allocation16_spill] sm:$0xff] }
 0x1a2   :  { %835 = vmatpush.msrb.mxu2 %v2119_v50 }
 0x1a3   :  { %908 = vmatpush.msrb.mxu3 %v1967_v16  ;;  %928 = vmatpush.msra.mxu0 %v1988_v21  ;;  %v2931_v16 = vld [vmem:[#allocation47_spill] sm:$0xff] }
 0x1a4   :  { %836 = vmatpush.msrb.mxu2 %v2128_v51 }
 0x1a5   :  { %909 = vmatpush.msrb.mxu3 %v1975_v17  ;;  %929 = vmatpush.msra.mxu0 %v1997_v23  ;;  %v112_v17 = vadd.f32 %v2931_v16, %v2930_v15  ;;  %v2553_v16 = vld [vmem:[#allocation4 + $0x188] sm:$0xff] }
 0x1a6   :  { %837 = vmatpush.msrb.mxu2 %v2132_v52 }
 0x1a7   :  { %910 = vmatpush.msrb.mxu3 %v1986_v20  ;;  %930 = vmatpush.msra.mxu0 %v2009_v26 }
 0x1a8   :  { %838 = vmatpush.msrb.mxu2 %v2137_v53 }
 0x1a9   :  { %911 = vmatpush.msrb.mxu3 %v1995_v22  ;;  %931 = vmatpush.msra.mxu0 %v2021_v28  ;;  %v2932_v22 = vld [vmem:[#allocation24_spill] sm:$0xff] }
 0x1aa   :  { %839 = vmatpush.msrb.mxu2 %v2142_v54 }
 0x1ab   :  { %912 = vmatpush.msrb.mxu3 %v2007_v25  ;;  %932 = vmatpush.msra.mxu0 %v2032_v31 }
 0x1ac   :  { %840 = vmatpush.msrb.mxu2 %v2151_v55 }
 0x1ad   :  { %913 = vmatpush.msrb.mxu3 %v2019_v27  ;;  %933 = vmatpush.msra.mxu0 %v2041_v33 }
 0x1ae   :  { %841 = vmatpush.msrb.mxu2 %v2155_v56 }
 0x1af   :  { %914 = vmatpush.msrb.mxu3 %v2030_v30  ;;  %934 = vmatpush.msra.mxu0 %v2053_v36 }
 0x1b0   :  { %842 = vmatpush.msrb.mxu2 %v2160_v57 }
 0x1b1   :  { %915 = vmatpush.msrb.mxu3 %v2039_v32  ;;  %935 = vmatpush.msra.mxu0 %v2064_v38 }
 0x1b2   :  { %843 = vmatpush.msrb.mxu2 %v2165_v58 }
 0x1b3   :  { %916 = vmatpush.msrb.mxu3 %v2051_v35  ;;  %936 = vmatpush.msra.mxu0 %v2075_v41  ;;  %v2933_v35 = vld [vmem:[#allocation23_spill] sm:$0xff] }
 0x1b4   :  { %844 = vmatpush.msrb.mxu2 %v2174_v59 }
 0x1b5   :  { %917 = vmatpush.msrb.mxu3 %v2062_v37  ;;  %937 = vmatpush.msra.mxu0 %v2084_v43 }
 0x1b6   :  { %845 = vmatpush.msrb.mxu2 %v2924_v7 }
 0x1b7   :  { %918 = vmatpush.msrb.mxu3 %v2925_v9  ;;  %938 = vmatpush.msra.mxu0 %v2926_v10  ;;  %v2532_v9 = vld [vmem:[#allocation4 + $0x1e8] sm:$0xff]  ;;  %v2536_v10 = vld [vmem:[#allocation4 + $0x1c0] sm:$0xff] }
 0x1b8   :  { %846 = vmatpush.msrb.mxu2 %v2927_v11 }
 0x1b9   :  { %919 = vmatpush.msrb.mxu3 %v2928_v12  ;;  %939 = vmatpush.msra.mxu0 %v2929_v13  ;;  %v2539_v12 = vld [vmem:[#allocation4 + $0x1c8] sm:$0xff] }
 0x1ba   :  { %v2546_v13 = vld [vmem:[#allocation4 + $0x1a8] sm:$0xff] }
 0x217   :  { %v622_v32 = vpop.f32.mrf.mxu0 }
 0x218   :  { %v627_v36 = vadd.f32 %v622_v32, %v2933_v35 }
 0x21c   :  { %v582_v18 = vpop.f32.mrf.mxu2  ;;  %v602_v20 = vpop.f32.mrf.mxu3 }
 0x21d   :  { %v625_v21 = vadd.f32 %v582_v18, %v112_v17  ;;  %v626_v23 = vadd.f32 %v602_v20, %v2932_v22  ;;  %v2560_v17 = vld [vmem:[#allocation4 + $0x168] sm:$0xff] }
 0x21e   :  { %v2567_v18 = vld [vmem:[#allocation4 + $0x148] sm:$0xff] }
 0x21f   :  { %v1581_v25 = vmul.f32 -1.442695, %v625_v21  ;;  %v1582_v26 = vmul.f32 -1.442695, %v626_v23  ;;  %v2574_v20 = vld [vmem:[#allocation4 + $0x128] sm:$0xff] }
 0x220   :  { %v2581_v21 = vld [vmem:[#allocation4 + $0x108] sm:$0xff] }
 0x221   :  { %1633 = vpow2.f32 %v1581_v25  ;;  %v2588_v22 = vld [vmem:[#allocation4 + $0xe8] sm:$0xff] }
 0x222   :  { %1635 = vpow2.f32 %v1582_v26  ;;  %v2595_v23 = vld [vmem:[#allocation4 + $0xc8] sm:$0xff] }
 0x223   :  { %v2602_v25 = vld [vmem:[#allocation4 + $0xa8] sm:$0xff] }
 0x224   :  { %v2609_v26 = vld [vmem:[#allocation4 + $0x88] sm:$0xff] }
 0x227   :  { %v1634_v27 = vpop.eup %1633 }
 0x228   :  { %v1636_v28 = vpop.eup %1635  ;;  %v631_v30 = vadd.f32 1.0, %v1634_v27  ;;  %v2616_v27 = vld [vmem:[#allocation4 + $0x68] sm:$0xff] }
 0x229   :  { %v650_v31 = vadd.f32 1.0, %v1636_v28  ;;  %v2623_v28 = vld [vmem:[#allocation4 + $0x48] sm:$0xff] }
 0x22a   :  { %1637 = vrcp.f32 %v631_v30  ;;  %v643_v60 = vand.u32 2147483648, %v631_v30  ;;  %v641_v3 = vand.u32 2147483647, %v631_v30  ;;  %vm637_vm3 = vweird.f32 %v631_v30 }
 0x22b   :  { %1639 = vrcp.f32 %v650_v31  ;;  %v662_v8 = vand.u32 2147483648, %v650_v31  ;;  %v660_v4 = vand.u32 2147483647, %v650_v31  ;;  %vm656_vm5 = vweird.f32 %v650_v31 }
 0x22c   :  { %1641 = vtanh.f32 %v627_v36  ;;  %v644_v19 = vor.u32 1.1754944e-38, %v643_v60  ;;  %vm642_vm6 = vcmp.eq.f32.partialorder %v641_v3, 8.507059e+37 }
 0x22d   :  { %v663_v24 = vor.u32 1.1754944e-38, %v662_v8  ;;  %vm661_vm8 = vcmp.eq.f32.partialorder %v660_v4, 8.507059e+37 }
 0x230   :  { %v1638_v33 = vpop.eup %1637 }
 0x231   :  { %v1640_v37 = vpop.eup %1639  ;;  %v633_v38 = vmul.f32 %v1638_v33, %v631_v30  ;;  %vm638_vm1 = vweird.f32 %v1638_v33  ;;  %v2630_v30 = vld [vmem:[#allocation4 + $0x28] sm:$0xff] }
 0x232   :  { %v652_v41 = vmul.f32 %v1640_v37, %v650_v31  ;;  %vm657_vm2 = vweird.f32 %v1640_v37  ;;  %vm639_vm4 = vmor %vm637_vm3, %vm638_vm1  ;;  %v1642_v61 = vpop.eup %1641  ;;  %v2637_v31 = vld [vmem:[#allocation4 + $0x8] sm:$0xff] }
 0x233   :  { %v634_v43 = vsub.f32 1.0, %v633_v38  ;;  %vm658_vm7 = vmor %vm656_vm5, %vm657_vm2  ;;  %v2935_v38 = vld [vmem:[#allocation26_spill] sm:$0xff] }
 0x234   :  { %v653_v40 = vsub.f32 1.0, %v652_v41 }
 0x235   :  { %v635_v46 = vmul.f32 %v1638_v33, %v634_v43 }
 0x236   :  { %v654_v6 = vmul.f32 %v1640_v37, %v653_v40 }
 0x237   :  { %v636_v42 = vadd.f32 %v1638_v33, %v635_v46 }
 0x238   :  { %v655_v5 = vadd.f32 %v1640_v37, %v654_v6 }
 0x239   :  { %v640_v0 = vsel %vm639_vm4, %v1638_v33, %v636_v42 }
 0x23a   :  { %v645_v62 = vsel %vm642_vm6, %v644_v19, %v640_v0  ;;  %v659_v63 = vsel %vm658_vm7, %v1640_v37, %v655_v5  ;;  %v2936_v5 = vld [vmem:[#allocation25_spill] sm:$0xff] }
 0x23b   :  { %v664_v14 = vsel %vm661_vm8, %v663_v24, %v659_v63  ;;  %v667_v39 = vmul.f32 %v645_v62, %v2465_v1 }
 0x23c   :  { %v668_v29 = vmul.f32 %v1642_v61, %v664_v14 }
 0x23e   :  { %v2523_v47 = vadd.f32 %v668_v29, %v667_v39 }
 0x240   :  { %694 = vmatmul.f32.vlgmr.msra.gmra.mxu1 %v2523_v47  ;;  %714 = vmatmul.f32.vlgmr.msra.gmra.mxu2 %v2523_v47 }
 0x241   :  { %734 = vmatmul.f32.vlgmr.msra.gmra.mxu3 %v2523_v47  ;;  %944 = vmatpush.msra.mxu1 %v2090_v44  ;;  %v2543_v44 = vld [vmem:[#allocation4 + $0x1a0] sm:$0xff] }
 0x242   :  { %1017 = vmatpush.msra.mxu2 %v2529_v2  ;;  %1037 = vmatpush.msra.mxu3 %v2532_v9 }
 0x243   :  { %945 = vmatpush.msra.mxu1 %v2099_v45  ;;  %v2550_v45 = vld [vmem:[#allocation4 + $0x180] sm:$0xff] }
 0x244   :  { %1018 = vmatpush.msra.mxu2 %v2536_v10  ;;  %1038 = vmatpush.msra.mxu3 %v2539_v12 }
 0x245   :  { %946 = vmatpush.msra.mxu1 %v2107_v48  ;;  %v2557_v48 = vld [vmem:[#allocation4 + $0x160] sm:$0xff] }
 0x246   :  { %1019 = vmatpush.msra.mxu2 %v2543_v44  ;;  %1039 = vmatpush.msra.mxu3 %v2546_v13 }
 0x247   :  { %947 = vmatpush.msra.mxu1 %v2112_v49  ;;  %v2564_v49 = vld [vmem:[#allocation4 + $0x140] sm:$0xff] }
 0x248   :  { %1020 = vmatpush.msra.mxu2 %v2550_v45  ;;  %1040 = vmatpush.msra.mxu3 %v2553_v16 }
 0x249   :  { %948 = vmatpush.msra.mxu1 %v2119_v50  ;;  %v2571_v50 = vld [vmem:[#allocation4 + $0x120] sm:$0xff] }
 0x24a   :  { %1021 = vmatpush.msra.mxu2 %v2557_v48  ;;  %1041 = vmatpush.msra.mxu3 %v2560_v17 }
 0x24b   :  { %949 = vmatpush.msra.mxu1 %v2128_v51  ;;  %v2578_v51 = vld [vmem:[#allocation4 + $0x100] sm:$0xff] }
 0x24c   :  { %1022 = vmatpush.msra.mxu2 %v2564_v49  ;;  %1042 = vmatpush.msra.mxu3 %v2567_v18 }
 0x24d   :  { %950 = vmatpush.msra.mxu1 %v2132_v52  ;;  %v2585_v52 = vld [vmem:[#allocation4 + $0xe0] sm:$0xff] }
 0x24e   :  { %1023 = vmatpush.msra.mxu2 %v2571_v50  ;;  %1043 = vmatpush.msra.mxu3 %v2574_v20 }
 0x24f   :  { %951 = vmatpush.msra.mxu1 %v2137_v53  ;;  %v2592_v53 = vld [vmem:[#allocation4 + $0xc0] sm:$0xff] }
 0x250   :  { %1024 = vmatpush.msra.mxu2 %v2578_v51  ;;  %1044 = vmatpush.msra.mxu3 %v2581_v21 }
 0x251   :  { %952 = vmatpush.msra.mxu1 %v2142_v54  ;;  %v2599_v54 = vld [vmem:[#allocation4 + $0xa0] sm:$0xff] }
 0x252   :  { %1025 = vmatpush.msra.mxu2 %v2585_v52  ;;  %1045 = vmatpush.msra.mxu3 %v2588_v22 }
 0x253   :  { %953 = vmatpush.msra.mxu1 %v2151_v55  ;;  %v2606_v55 = vld [vmem:[#allocation4 + $0x80] sm:$0xff] }
 0x254   :  { %1026 = vmatpush.msra.mxu2 %v2592_v53  ;;  %1046 = vmatpush.msra.mxu3 %v2595_v23 }
 0x255   :  { %954 = vmatpush.msra.mxu1 %v2155_v56  ;;  %v2613_v56 = vld [vmem:[#allocation4 + $0x60] sm:$0xff] }
 0x256   :  { %1027 = vmatpush.msra.mxu2 %v2599_v54  ;;  %1047 = vmatpush.msra.mxu3 %v2602_v25 }
 0x257   :  { %955 = vmatpush.msra.mxu1 %v2160_v57  ;;  %v2620_v57 = vld [vmem:[#allocation4 + $0x40] sm:$0xff] }
 0x258   :  { %1028 = vmatpush.msra.mxu2 %v2606_v55  ;;  %1048 = vmatpush.msra.mxu3 %v2609_v26 }
 0x259   :  { %956 = vmatpush.msra.mxu1 %v2165_v58  ;;  %v2627_v58 = vld [vmem:[#allocation4 + $0x20] sm:$0xff] }
 0x25a   :  { %1029 = vmatpush.msra.mxu2 %v2613_v56  ;;  %1049 = vmatpush.msra.mxu3 %v2616_v27 }
 0x25b   :  { %957 = vmatpush.msra.mxu1 %v2174_v59  ;;  %v2634_v59 = vld [vmem:[#allocation4] sm:$0xff] }
 0x25c   :  { %1030 = vmatpush.msra.mxu2 %v2620_v57  ;;  %1050 = vmatpush.msra.mxu3 %v2623_v28 }
 0x25d   :  { %958 = vmatpush.msra.mxu1 %v2924_v7  ;;  %v2934_v7 = vld [vmem:[#allocation48_spill] sm:$0xff] }
 0x25e   :  { %1031 = vmatpush.msra.mxu2 %v2627_v58  ;;  %1051 = vmatpush.msra.mxu3 %v2630_v30  ;;  %v115_v32 = vadd.f32 %v2934_v7, %v2930_v15 }
 0x25f   :  { %959 = vmatpush.msra.mxu1 %v2927_v11 }
 0x260   :  { %1032 = vmatpush.msra.mxu2 %v2634_v59  ;;  %1052 = vmatpush.msra.mxu3 %v2637_v31 }
 0x2bd   :  { %v695_v33 = vpop.f32.mrf.mxu1 }
 0x2be   :  { %v738_v35 = vadd.f32 %v695_v33, %v115_v32 }
 0x2c0   :  { %v1583_v36 = vmul.f32 -1.442695, %v738_v35 }
 0x2c2   :  { %1643 = vpow2.f32 %v1583_v36 }
 0x2c3   :  { %v715_v37 = vpop.f32.mrf.mxu2 }
 0x2c4   :  { %v739_v41 = vadd.f32 %v715_v37, %v2935_v38  ;;  %v735_v4 = vpop.f32.mrf.mxu3 }
 0x2c5   :  { %v740_v0 = vadd.f32 %v735_v4, %v2936_v5 }
 0x2c6   :  { %v1584_v43 = vmul.f32 -1.442695, %v739_v41 }
 0x2c8   :  { %v1644_v11 = vpop.eup %1643  ;;  %1645 = vpow2.f32 %v1584_v43 }
 0x2c9   :  { %v744_v60 = vadd.f32 1.0, %v1644_v11 }
 0x2cb   :  { %1647 = vrcp.f32 %v744_v60  ;;  %v756_v62 = vand.u32 2147483648, %v744_v60  ;;  %vm750_vm10 = vweird.f32 %v744_v60  ;;  %v754_v14 = vand.u32 2147483647, %v744_v60 }
 0x2cd   :  { %v757_v33 = vor.u32 1.1754944e-38, %v756_v62  ;;  %vm755_vm13 = vcmp.eq.f32.partialorder %v754_v14, 8.507059e+37 }
 0x2ce   :  { %v1646_v40 = vpop.eup %1645 }
 0x2cf   :  { %v763_v46 = vadd.f32 1.0, %v1646_v40 }
 0x2d1   :  { %v1648_v3 = vpop.eup %1647  ;;  %1649 = vrcp.f32 %v763_v46  ;;  %v775_v39 = vand.u32 2147483648, %v763_v46  ;;  %v773_v32 = vand.u32 2147483647, %v763_v46  ;;  %vm769_vm14 = vweird.f32 %v763_v46 }
 0x2d2   :  { %v746_v8 = vmul.f32 %v1648_v3, %v744_v60  ;;  %vm751_vm9 = vweird.f32 %v1648_v3  ;;  %1651 = vtanh.f32 %v740_v0 }
 0x2d3   :  { %vm752_vm11 = vmor %vm750_vm10, %vm751_vm9  ;;  %v776_v37 = vor.u32 1.1754944e-38, %v775_v39  ;;  %vm774_vm0 = vcmp.eq.f32.partialorder %v773_v32, 8.507059e+37 }
 0x2d4   :  { %v747_v6 = vsub.f32 1.0, %v746_v8  ;;  %v2660_v8 = vld [vmem:[#allocation4 + $0x1b0] sm:$0xff] }
 0x2d6   :  { %v748_v42 = vmul.f32 %v1648_v3, %v747_v6  ;;  %v2665_v6 = vld [vmem:[#allocation4 + $0x190] sm:$0xff] }
 0x2d7   :  { %v1650_v19 = vpop.eup %1649 }
 0x2d8   :  { %v765_v24 = vmul.f32 %v1650_v19, %v763_v46  ;;  %v749_v61 = vadd.f32 %v1648_v3, %v748_v42  ;;  %vm770_vm12 = vweird.f32 %v1650_v19  ;;  %v1652_v41 = vpop.eup %1651  ;;  %v2655_v46 = vld [vmem:[#allocation4 + $0x1d0] sm:$0xff] }
 0x2d9   :  { %vm771_vm15 = vmor %vm769_vm14, %vm770_vm12 }
 0x2da   :  { %v766_v63 = vsub.f32 1.0, %v765_v24  ;;  %v753_v29 = vsel %vm752_vm11, %v1648_v3, %v749_v61  ;;  %v2650_v3 = vld [vmem:[#allocation4 + $0x1f0] sm:$0xff] }
 0x2db   :  { %v758_v36 = vsel %vm755_vm13, %v757_v33, %v753_v29 }
 0x2dc   :  { %v767_v7 = vmul.f32 %v1650_v19, %v766_v63  ;;  %v780_v11 = vmul.f32 %v758_v36, %v2523_v47 }
 0x2de   :  { %v768_v35 = vadd.f32 %v1650_v19, %v767_v7 }
 0x2e0   :  { %v772_v38 = vsel %vm771_vm15, %v1650_v19, %v768_v35 }
 0x2e1   :  { %v777_v43 = vsel %vm774_vm0, %v776_v37, %v772_v38 }
 0x2e2   :  { %v781_v60 = vmul.f32 %v1652_v41, %v777_v43  ;;  %v1277_v43 = vld [vmem:[#allocation4 + $0x1f8] sm:$0xff] }
 0x2e4   :  { %v2645_v40 = vadd.f32 %v781_v60, %v780_v11  ;;  %v1276_v11 = vld [vmem:[#allocation4 + $0x1d8] sm:$0xff] }
 0x2e5   :  { %v1275_v60 = vld [vmem:[#allocation4 + $0x1b8] sm:$0xff] }
 0x2e6   :  { %807 = vmatmul.f32.vlgmr.msrb.gmra.mxu0 %v2645_v40  ;;  %827 = vmatmul.f32.vlgmr.msrb.gmra.mxu1 %v2645_v40 }
 0x2e7   :  { %847 = vmatmul.f32.vlgmr.msrb.gmra.mxu2 %v2645_v40  ;;  %1057 = vmatpush.msrb.mxu0 %v2650_v3 }
 0x2e8   :  { %1130 = vmatpush.msrb.mxu1 %v2529_v2  ;;  %1150 = vmatpush.msrb.mxu2 %v2532_v9  ;;  %v2670_v2 = vld [vmem:[#allocation4 + $0x170] sm:$0xff] }
 0x2e9   :  { %1058 = vmatpush.msrb.mxu0 %v2655_v46  ;;  %v2675_v9 = vld [vmem:[#allocation4 + $0x150] sm:$0xff] }
 0x2ea   :  { %1131 = vmatpush.msrb.mxu1 %v2536_v10  ;;  %1151 = vmatpush.msrb.mxu2 %v2539_v12  ;;  %v2680_v10 = vld [vmem:[#allocation4 + $0x130] sm:$0xff] }
 0x2eb   :  { %1059 = vmatpush.msrb.mxu0 %v2660_v8  ;;  %v2685_v12 = vld [vmem:[#allocation4 + $0x110] sm:$0xff] }
 0x2ec   :  { %1132 = vmatpush.msrb.mxu1 %v2543_v44  ;;  %1152 = vmatpush.msrb.mxu2 %v2546_v13  ;;  %v2690_v44 = vld [vmem:[#allocation4 + $0xf0] sm:$0xff] }
 0x2ed   :  { %1060 = vmatpush.msrb.mxu0 %v2665_v6  ;;  %v2695_v13 = vld [vmem:[#allocation4 + $0xd0] sm:$0xff] }
 0x2ee   :  { %1133 = vmatpush.msrb.mxu1 %v2550_v45  ;;  %1153 = vmatpush.msrb.mxu2 %v2553_v16  ;;  %v2700_v45 = vld [vmem:[#allocation4 + $0xb0] sm:$0xff] }
 0x2ef   :  { %1061 = vmatpush.msrb.mxu0 %v2670_v2  ;;  %v2705_v16 = vld [vmem:[#allocation4 + $0x90] sm:$0xff] }
 0x2f0   :  { %1134 = vmatpush.msrb.mxu1 %v2557_v48  ;;  %1154 = vmatpush.msrb.mxu2 %v2560_v17  ;;  %v2710_v48 = vld [vmem:[#allocation4 + $0x70] sm:$0xff] }
 0x2f1   :  { %1062 = vmatpush.msrb.mxu0 %v2675_v9  ;;  %v2715_v17 = vld [vmem:[#allocation4 + $0x50] sm:$0xff] }
 0x2f2   :  { %1135 = vmatpush.msrb.mxu1 %v2564_v49  ;;  %1155 = vmatpush.msrb.mxu2 %v2567_v18  ;;  %v2720_v49 = vld [vmem:[#allocation4 + $0x30] sm:$0xff] }
 0x2f3   :  { %1063 = vmatpush.msrb.mxu0 %v2680_v10  ;;  %v2725_v18 = vld [vmem:[#allocation4 + $0x10] sm:$0xff] }
 0x2f4   :  { %1136 = vmatpush.msrb.mxu1 %v2571_v50  ;;  %1156 = vmatpush.msrb.mxu2 %v2574_v20  ;;  %v2937_v50 = vld [vmem:[#allocation19_spill] sm:$0xff] }
 0x2f5   :  { %1064 = vmatpush.msrb.mxu0 %v2685_v12  ;;  %v118_v20 = vadd.f32 %v2937_v50, %v2930_v15 }
 0x2f6   :  { %1137 = vmatpush.msrb.mxu1 %v2578_v51  ;;  %1157 = vmatpush.msrb.mxu2 %v2581_v21 }
 0x2f7   :  { %1065 = vmatpush.msrb.mxu0 %v2690_v44 }
 0x2f8   :  { %1138 = vmatpush.msrb.mxu1 %v2585_v52  ;;  %1158 = vmatpush.msrb.mxu2 %v2588_v22  ;;  %v2938_v22 = vld [vmem:[#allocation28_spill] sm:$0xff] }
 0x2f9   :  { %1066 = vmatpush.msrb.mxu0 %v2695_v13 }
 0x2fa   :  { %1139 = vmatpush.msrb.mxu1 %v2592_v53  ;;  %1159 = vmatpush.msrb.mxu2 %v2595_v23 }
 0x2fb   :  { %1067 = vmatpush.msrb.mxu0 %v2700_v45 }
 0x2fc   :  { %1140 = vmatpush.msrb.mxu1 %v2599_v54  ;;  %1160 = vmatpush.msrb.mxu2 %v2602_v25 }
 0x2fd   :  { %1068 = vmatpush.msrb.mxu0 %v2705_v16 }
 0x2fe   :  { %1141 = vmatpush.msrb.mxu1 %v2606_v55  ;;  %1161 = vmatpush.msrb.mxu2 %v2609_v26 }
 0x2ff   :  { %1069 = vmatpush.msrb.mxu0 %v2710_v48 }
 0x300   :  { %1142 = vmatpush.msrb.mxu1 %v2613_v56  ;;  %1162 = vmatpush.msrb.mxu2 %v2616_v27 }
 0x301   :  { %1070 = vmatpush.msrb.mxu0 %v2715_v17 }
 0x302   :  { %1143 = vmatpush.msrb.mxu1 %v2620_v57  ;;  %1163 = vmatpush.msrb.mxu2 %v2623_v28  ;;  %v2939_v28 = vld [vmem:[#allocation27_spill] sm:$0xff] }
 0x303   :  { %1071 = vmatpush.msrb.mxu0 %v2720_v49 }
 0x304   :  { %1144 = vmatpush.msrb.mxu1 %v2627_v58  ;;  %1164 = vmatpush.msrb.mxu2 %v2630_v30 }
 0x305   :  { %1072 = vmatpush.msrb.mxu0 %v2725_v18 }
 0x306   :  { %1145 = vmatpush.msrb.mxu1 %v2634_v59  ;;  %1165 = vmatpush.msrb.mxu2 %v2637_v31 }
 0x363   :  { %v808_v51 = vpop.f32.mrf.mxu0  ;;  %v828_v21 = vpop.f32.mrf.mxu1 }
 0x364   :  { %v851_v52 = vadd.f32 %v808_v51, %v118_v20  ;;  %v852_v53 = vadd.f32 %v828_v21, %v2938_v22  ;;  %v1265_v51 = vld [vmem:[#allocation4 + $0x78] sm:$0xff] }
 0x365   :  { %v1264_v21 = vld [vmem:[#allocation4 + $0x58] sm:$0xff] }
 0x366   :  { %v1585_v23 = vmul.f32 -1.442695, %v851_v52  ;;  %v1586_v54 = vmul.f32 -1.442695, %v852_v53  ;;  %v1263_v53 = vld [vmem:[#allocation4 + $0x38] sm:$0xff] }
 0x368   :  { %1653 = vpow2.f32 %v1585_v23  ;;  %v1262_v23 = vld [vmem:[#allocation4 + $0x18] sm:$0xff] }
 0x369   :  { %1655 = vpow2.f32 %v1586_v54 }
 0x36a   :  { %v848_v27 = vpop.f32.mrf.mxu2 }
 0x36b   :  { %v853_v58 = vadd.f32 %v848_v27, %v2939_v28 }
 0x36e   :  { %v1654_v25 = vpop.eup %1653 }
 0x36f   :  { %v1656_v55 = vpop.eup %1655  ;;  %v857_v26 = vadd.f32 1.0, %v1654_v25 }
 0x370   :  { %v876_v56 = vadd.f32 1.0, %v1656_v55 }
 0x371   :  { %1657 = vrcp.f32 %v857_v26  ;;  %v869_v42 = vand.u32 2147483648, %v857_v26  ;;  %v867_v0 = vand.u32 2147483647, %v857_v26  ;;  %vm863_vm3 = vweird.f32 %v857_v26 }
 0x372   :  { %1659 = vrcp.f32 %v876_v56  ;;  %v888_v24 = vand.u32 2147483648, %v876_v56  ;;  %v886_v62 = vand.u32 2147483647, %v876_v56  ;;  %vm882_vm5 = vweird.f32 %v876_v56 }
 0x373   :  { %1661 = vtanh.f32 %v853_v58  ;;  %v870_v14 = vor.u32 1.1754944e-38, %v869_v42  ;;  %vm868_vm6 = vcmp.eq.f32.partialorder %v867_v0, 8.507059e+37 }
 0x374   :  { %v889_v7 = vor.u32 1.1754944e-38, %v888_v24  ;;  %vm887_vm8 = vcmp.eq.f32.partialorder %v886_v62, 8.507059e+37 }
 0x377   :  { %v1658_v57 = vpop.eup %1657 }
 0x378   :  { %v1660_v30 = vpop.eup %1659  ;;  %v859_v59 = vmul.f32 %v1658_v57, %v857_v26  ;;  %vm864_vm1 = vweird.f32 %v1658_v57 }
 0x379   :  { %v878_v31 = vmul.f32 %v1660_v30, %v876_v56  ;;  %vm883_vm2 = vweird.f32 %v1660_v30  ;;  %vm865_vm4 = vmor %vm863_vm3, %vm864_vm1  ;;  %v1662_v32 = vpop.eup %1661  ;;  %v2942_v56 = vld [vmem:[#allocation29_spill] sm:$0xff] }
 0x37a   :  { %v860_v4 = vsub.f32 1.0, %v859_v59  ;;  %vm884_vm7 = vmor %vm882_vm5, %vm883_vm2 }
 0x37b   :  { %v879_v19 = vsub.f32 1.0, %v878_v31 }
 0x37c   :  { %v861_v5 = vmul.f32 %v1658_v57, %v860_v4 }
 0x37d   :  { %v880_v61 = vmul.f32 %v1660_v30, %v879_v19 }
 0x37e   :  { %v862_v63 = vadd.f32 %v1658_v57, %v861_v5 }
 0x37f   :  { %v881_v39 = vadd.f32 %v1660_v30, %v880_v61 }
 0x380   :  { %v866_v29 = vsel %vm865_vm4, %v1658_v57, %v862_v63 }
 0x381   :  { %v871_v33 = vsel %vm868_vm6, %v870_v14, %v866_v29  ;;  %v885_v35 = vsel %vm884_vm7, %v1660_v30, %v881_v39 }
 0x382   :  { %v890_v36 = vsel %vm887_vm8, %v889_v7, %v885_v35  ;;  %v893_v37 = vmul.f32 %v871_v33, %v2645_v40 }
 0x383   :  { %v894_v38 = vmul.f32 %v1662_v32, %v890_v36 }
 0x385   :  { %v2735_v41 = vadd.f32 %v894_v38, %v893_v37  ;;  %v2943_v37 = vmov 0.0  }
 0x387   :  { %920 = vmatmul.f32.vlgmr.msrb.gmra.mxu3 %v2735_v41  ;;  %940 = vmatmul.f32.vlgmr.msra.gmra.mxu0 %v2735_v41 }
 0x388   :  { %960 = vmatmul.f32.vlgmr.msra.gmra.mxu1 %v2735_v41  ;;  %1170 = vmatpush.msrb.mxu3 %v2650_v3  ;;  %v1274_v3 = vld [vmem:[#allocation4 + $0x198] sm:$0xff] }
 0x389   :  { %1278 = vmatpush.msra.mxu0 %v1277_v43  ;;  %v2944_v43 = vld [vmem:[#allocation37_spill] sm:$0xff] }
 0x38a   :  { %1171 = vmatpush.msrb.mxu3 %v2655_v46  ;;  %v1273_v46 = vld [vmem:[#allocation4 + $0x178] sm:$0xff] }
 0x38b   :  { %1279 = vmatpush.msra.mxu0 %v1276_v11  ;;  %v124_v11 = vadd.f32 %v2944_v43, %v2930_v15 }
 0x38c   :  { %1172 = vmatpush.msrb.mxu3 %v2660_v8  ;;  %v1272_v8 = vld [vmem:[#allocation4 + $0x158] sm:$0xff] }
 0x38d   :  { %1280 = vmatpush.msra.mxu0 %v1275_v60 }
 0x38e   :  { %1173 = vmatpush.msrb.mxu3 %v2665_v6  ;;  %v1271_v6 = vld [vmem:[#allocation4 + $0x138] sm:$0xff] }
 0x38f   :  { %1281 = vmatpush.msra.mxu0 %v1274_v3 }
 0x390   :  { %1174 = vmatpush.msrb.mxu3 %v2670_v2 }
 0x391   :  { %1282 = vmatpush.msra.mxu0 %v1273_v46 }
 0x392   :  { %1175 = vmatpush.msrb.mxu3 %v2675_v9  ;;  %v1270_v9 = vld [vmem:[#allocation4 + $0x118] sm:$0xff] }
 0x393   :  { %1283 = vmatpush.msra.mxu0 %v1272_v8  ;;  %v2945_v8 = vld [vmem:[#allocation32_spill] sm:$0xff] }
 0x394   :  { %1176 = vmatpush.msrb.mxu3 %v2680_v10  ;;  %v2940_v10 = vld [vmem:[#allocation30_spill] sm:$0xff] }
 0x395   :  { %1284 = vmatpush.msra.mxu0 %v1271_v6 }
 0x396   :  { %1177 = vmatpush.msrb.mxu3 %v2685_v12 }
 0x397   :  { %1285 = vmatpush.msra.mxu0 %v1270_v9  ;;  %v2947_v9 = vld [vmem:[#allocation39_spill] sm:$0xff] }
 0x398   :  { %1178 = vmatpush.msrb.mxu3 %v2690_v44  ;;  %v1269_v44 = vld [vmem:[#allocation4 + $0xf8] sm:$0xff] }
 0x399   :  { %1286 = vmatpush.msra.mxu0 %v1269_v44 }
 0x39a   :  { %1179 = vmatpush.msrb.mxu3 %v2695_v13 }
 0x39c   :  { %1180 = vmatpush.msrb.mxu3 %v2700_v45  ;;  %v1268_v45 = vld [vmem:[#allocation4 + $0xd8] sm:$0xff] }
 0x39d   :  { %1287 = vmatpush.msra.mxu0 %v1268_v45 }
 0x39e   :  { %1181 = vmatpush.msrb.mxu3 %v2705_v16  ;;  %v1267_v16 = vld [vmem:[#allocation4 + $0xb8] sm:$0xff] }
 0x39f   :  { %1288 = vmatpush.msra.mxu0 %v1267_v16 }
 0x3a0   :  { %1182 = vmatpush.msrb.mxu3 %v2710_v48  ;;  %v2941_v48 = vld [vmem:[#allocation36_spill] sm:$0xff] }
 0x3a2   :  { %1183 = vmatpush.msrb.mxu3 %v2715_v17  ;;  %v121_v17 = vadd.f32 %v2941_v48, %v2930_v15  ;;  %v2948_v48 = vld [vmem:[#allocation40_spill] sm:$0xff] }
 0x3a4   :  { %1184 = vmatpush.msrb.mxu3 %v2720_v49 }
 0x3a6   :  { %1185 = vmatpush.msrb.mxu3 %v2725_v18  ;;  %v1266_v18 = vld [vmem:[#allocation4 + $0x98] sm:$0xff] }
 0x3a7   :  { %1289 = vmatpush.msra.mxu0 %v1266_v18 }
 0x3a9   :  { %1290 = vmatpush.msra.mxu0 %v1265_v51 }
 0x3ab   :  { %1291 = vmatpush.msra.mxu0 %v1264_v21 }
 0x3ad   :  { %1292 = vmatpush.msra.mxu0 %v1263_v53 }
 0x3af   :  { %1293 = vmatpush.msra.mxu0 %v1262_v23  ;;  %v2949_v23 = vld [vmem:[#allocation41_spill] sm:$0xff] }
 0x404   :  { %v941_v2 = vpop.f32.mrf.mxu0 }
 0x405   :  { %v965_v12 = vadd.f32 %v941_v2, %v2940_v10  ;;  %v961_v25 = vpop.f32.mrf.mxu1  ;;  %v2946_v2 = vld [vmem:[#allocation20_spill] sm:$0xff] }
 0x406   :  { %v966_v27 = vadd.f32 %v961_v25, %v2942_v56  ;;  %v229_v10 = vadd.f32 %v2947_v9, %v2946_v2  ;;  %v2950_v25 = vld [vmem:[#allocation31_spill] sm:$0xff] }
 0x407   :  { %v1588_v13 = vmul.f32 -1.442695, %v965_v12 }
 0x409   :  { %1663 = vpow2.f32 %v1588_v13 }
 0x40a   :  { %v921_v49 = vpop.f32.mrf.mxu3 }
 0x40b   :  { %v964_v50 = vadd.f32 %v921_v49, %v121_v17  ;;  %v232_v17 = vadd.f32 %v2948_v48, %v2946_v2 }
 0x40d   :  { %v1587_v20 = vmul.f32 -1.442695, %v964_v50 }
 0x40f   :  { %v1664_v52 = vpop.eup %1663  ;;  %1665 = vpow2.f32 %v1587_v20 }
 0x410   :  { %v989_v22 = vadd.f32 1.0, %v1664_v52 }
 0x412   :  { %1667 = vrcp.f32 %v989_v22  ;;  %v1001_v58 = vand.u32 2147483648, %v989_v22  ;;  %v999_v59 = vand.u32 2147483647, %v989_v22  ;;  %vm995_vm10 = vweird.f32 %v989_v22 }
 0x414   :  { %v1002_v19 = vor.u32 1.1754944e-38, %v1001_v58  ;;  %vm1000_vm12 = vcmp.eq.f32.partialorder %v999_v59, 8.507059e+37  ;;  %v2951_v58 = vld [vmem:[#allocation42_spill] sm:$0xff] }
 0x415   :  { %v1666_v54 = vpop.eup %1665 }
 0x416   :  { %v970_v55 = vadd.f32 1.0, %v1666_v54  ;;  %v235_v54 = vadd.f32 %v2949_v23, %v2946_v2 }
 0x418   :  { %v1668_v26 = vpop.eup %1667  ;;  %1669 = vrcp.f32 %v970_v55  ;;  %v982_v62 = vand.u32 2147483648, %v970_v55  ;;  %v980_v39 = vand.u32 2147483647, %v970_v55  ;;  %vm976_vm14 = vweird.f32 %v970_v55 }
 0x419   :  { %v991_v57 = vmul.f32 %v1668_v26, %v989_v22  ;;  %1671 = vtanh.f32 %v966_v27  ;;  %vm996_vm9 = vweird.f32 %v1668_v26 }
 0x41a   :  { %vm997_vm11 = vmor %vm995_vm10, %vm996_vm9  ;;  %v983_v7 = vor.u32 1.1754944e-38, %v982_v62  ;;  %vm981_vm0 = vcmp.eq.f32.partialorder %v980_v39, 8.507059e+37 }
 0x41b   :  { %v992_v28 = vsub.f32 1.0, %v991_v57 }
 0x41d   :  { %v993_v30 = vmul.f32 %v1668_v26, %v992_v28 }
 0x41e   :  { %v1670_v31 = vpop.eup %1669 }
 0x41f   :  { %v994_v4 = vadd.f32 %v1668_v26, %v993_v30  ;;  %v972_v42 = vmul.f32 %v1670_v31, %v970_v55  ;;  %v1672_v24 = vpop.eup %1671  ;;  %vm977_vm13 = vweird.f32 %v1670_v31  ;;  %v238_v30 = vadd.f32 %v2951_v58, %v2946_v2 }
 0x420   :  { %vm978_vm15 = vmor %vm976_vm14, %vm977_vm13 }
 0x421   :  { %v998_v5 = vsel %vm997_vm11, %v1668_v26, %v994_v4  ;;  %v973_v0 = vsub.f32 1.0, %v972_v42 }
 0x422   :  { %v1003_v61 = vsel %vm1000_vm12, %v1002_v19, %v998_v5 }
 0x423   :  { %v1007_v63 = vmul.f32 %v1672_v24, %v1003_v61  ;;  %v974_v14 = vmul.f32 %v1670_v31, %v973_v0 }
 0x425   :  { %v975_v29 = vadd.f32 %v1670_v31, %v974_v14 }
 0x427   :  { %v979_v32 = vsel %vm978_vm15, %v1670_v31, %v975_v29 }
 0x428   :  { %v984_v33 = vsel %vm981_vm0, %v983_v7, %v979_v32 }
 0x429   :  { %v1006_v35 = vmul.f32 %v984_v33, %v2735_v41 }
 0x42b   :  { %v2761_v36 = vadd.f32 %v1007_v63, %v1006_v35 }
 0x42d   :  { %1033 = vmatmul.f32.vlgmr.msra.gmra.mxu2 %v2761_v36  ;;  %1053 = vmatmul.f32.vlgmr.msra.gmra.mxu3 %v2761_v36 }
 0x42e   :  { %1073 = vmatmul.f32.vlgmr.msrb.gmra.mxu0 %v2761_v36 }
 0x436   :  { %1294 = vmatmul.f32.vlgmr.msra.gmra.mxu0 %v2943_v37 }
 0x43e   :  { %1297 = vmatmul.f32.gmra.mxu0 %v2380_v34 }
 0x446   :  { %1300 = vmatmul.f32.gmra.mxu0 %v2465_v1 }
 0x44e   :  { %1303 = vmatmul.f32.gmra.mxu0 %v2523_v47 }
 0x456   :  { %1306 = vmatmul.f32.gmra.mxu0 %v2645_v40 }
 0x45e   :  { %1309 = vmatmul.f32.gmra.mxu0 %v2735_v41 }
 0x466   :  { %1312 = vmatmul.f32.gmra.mxu0 %v2761_v36 }
 0x4ab   :  { %v1074_v38 = vpop.f32.mrf.mxu0 }
 0x4ac   :  { %v1079_v55 = vadd.f32 %v1074_v38, %v2950_v25 }
 0x4b0   :  { %v1034_v60 = vpop.f32.mrf.mxu2  ;;  %v1054_v3 = vpop.f32.mrf.mxu3 }
 0x4b1   :  { %v1077_v46 = vadd.f32 %v1034_v60, %v124_v11  ;;  %v1078_v6 = vadd.f32 %v1054_v3, %v2945_v8 }
 0x4b3   :  { %v1589_v12 = vmul.f32 -1.442695, %v1077_v46  ;;  %v1590_v44 = vmul.f32 -1.442695, %v1078_v6  ;;  %v1295_v13 = vpop.f32.mrf.mxu0 }
 0x4b4   :  { %v1319_v45 = vadd.f32 %v1295_v13, %v229_v10 }
 0x4b5   :  { %1673 = vpow2.f32 %v1589_v12 }
 0x4b6   :  { %1675 = vpow2.f32 %v1590_v44  ;;  %v1593_v16 = vmul.f32 -1.442695, %v1319_v45 }
 0x4b8   :  { %1677 = vpow2.f32 %v1593_v16 }
 0x4bb   :  { %v1674_v49 = vpop.eup %1673  ;;  %v1298_v18 = vpop.f32.mrf.mxu0 }
 0x4bc   :  { %v1676_v50 = vpop.eup %1675  ;;  %v1083_v20 = vadd.f32 1.0, %v1674_v49  ;;  %v1320_v51 = vadd.f32 %v1298_v18, %v232_v17 }
 0x4bd   :  { %v1102_v21 = vadd.f32 1.0, %v1676_v50 }
 0x4be   :  { %v1678_v52 = vpop.eup %1677  ;;  %1679 = vrcp.f32 %v1083_v20  ;;  %v1594_v53 = vmul.f32 -1.442695, %v1320_v51  ;;  %v1093_v59 = vand.u32 2147483647, %v1083_v20  ;;  %v1095_v19 = vand.u32 2147483648, %v1083_v20 }
 0x4bf   :  { %1681 = vrcp.f32 %v1102_v21  ;;  %v2780_v22 = vadd.f32 1.0, %v1678_v52  ;;  %v1114_v5 = vand.u32 2147483648, %v1102_v21  ;;  %vm1089_vm1 = vweird.f32 %v1083_v20 }
 0x4c0   :  { %vm1108_vm2 = vweird.f32 %v1102_v21  ;;  %v1112_v63 = vand.u32 2147483647, %v1102_v21  ;;  %vm2790_vm4 = vcmp.eq.f32.partialorder %v1093_v59, 8.507059e+37  ;;  %v1096_v33 = vor.u32 1.1754944e-38, %v1095_v19 }
 0x4c1   :  { %1683 = vrcp.f32 %v2780_v22  ;;  %v1115_v35 = vor.u32 1.1754944e-38, %v1114_v5  ;;  %v1376_v11 = vand.u32 2147483647, %v2780_v22  ;;  %v1378_v60 = vand.u32 2147483648, %v2780_v22 }
 0x4c2   :  { %1685 = vpow2.f32 %v1594_v53  ;;  %vm1113_vm9 = vcmp.eq.f32.partialorder %v1112_v63, 8.507059e+37  ;;  %vm1372_vm10 = vweird.f32 %v2780_v22 }
 0x4c3   :  { %v1301_v26 = vpop.f32.mrf.mxu0  ;;  %1687 = vtanh.f32 %v2380_v34  ;;  %v1379_v16 = vor.u32 1.1754944e-38, %v1378_v60  ;;  %vm1377_vm12 = vcmp.eq.f32.partialorder %v1376_v11, 8.507059e+37 }
 0x4c4   :  { %v1680_v56 = vpop.eup %1679  ;;  %v1321_v27 = vadd.f32 %v1301_v26, %v235_v54  ;;  %1689 = vtanh.f32 %v1079_v55 }
 0x4c5   :  { %v1682_v57 = vpop.eup %1681  ;;  %v1085_v28 = vmul.f32 %v1680_v56, %v1083_v20  ;;  %vm1090_vm3 = vweird.f32 %v1680_v56  ;;  %v2954_v20 = vld [vmem:[#allocation43_spill] sm:$0xff] }
 0x4c6   :  { %v1104_v31 = vmul.f32 %v1682_v57, %v1102_v21  ;;  %v1595_v4 = vmul.f32 -1.442695, %v1321_v27  ;;  %vm1109_vm5 = vweird.f32 %v1682_v57  ;;  %vm1091_vm6 = vmor %vm1089_vm1, %vm1090_vm3  ;;  %v241_v51 = vadd.f32 %v2954_v20, %v2946_v2 }
 0x4c7   :  { %v1086_v42 = vsub.f32 1.0, %v1085_v28  ;;  %v1684_v0 = vpop.eup %1683  ;;  %vm1110_vm7 = vmor %vm1108_vm2, %vm1109_vm5 }
 0x4c8   :  { %v1105_v24 = vsub.f32 1.0, %v1104_v31  ;;  %1691 = vpow2.f32 %v1595_v4  ;;  %v1686_v61 = vpop.eup %1685  ;;  %v1368_v34 = vmul.f32 %v1684_v0, %v2780_v22  ;;  %vm1373_vm8 = vweird.f32 %v1684_v0 }
 0x4c9   :  { %v1087_v62 = vmul.f32 %v1680_v56, %v1086_v42  ;;  %v2794_v29 = vadd.f32 1.0, %v1686_v61  ;;  %v1688_v7 = vpop.eup %1687  ;;  %vm1374_vm11 = vmor %vm1372_vm10, %vm1373_vm8 }
 0x4ca   :  { %v1106_v39 = vmul.f32 %v1682_v57, %v1105_v24  ;;  %v1369_v37 = vsub.f32 1.0, %v1368_v34  ;;  %v1690_v3 = vpop.eup %1689 }
 0x4cb   :  { %v1088_v32 = vadd.f32 %v1680_v56, %v1087_v62  ;;  %v1304_v38 = vpop.f32.mrf.mxu0  ;;  %1693 = vrcp.f32 %v2794_v29  ;;  %v1391_v55 = vand.u32 2147483647, %v2794_v29  ;;  %v1393_v26 = vand.u32 2147483648, %v2794_v29 }
 0x4cc   :  { %v1107_v43 = vadd.f32 %v1682_v57, %v1106_v39  ;;  %v1370_v8 = vmul.f32 %v1684_v0, %v1369_v37  ;;  %v1322_v6 = vadd.f32 %v1304_v38, %v238_v30  ;;  %v2955_v30 = vld [vmem:[#allocation44_spill] sm:$0xff]  ;;  %vm1387_vm14 = vweird.f32 %v2794_v29 }
 0x4cd   :  { %v1092_v46 = vsel %vm1091_vm6, %v1680_v56, %v1088_v32  ;;  %v244_v59 = vadd.f32 %v2955_v30, %v2946_v2  ;;  %vm1392_vm0 = vcmp.eq.f32.partialorder %v1391_v55, 8.507059e+37 }
 0x4ce   :  { %v1692_v9 = vpop.eup %1691  ;;  %v1097_v10 = vsel %vm2790_vm4, %v1096_v33, %v1092_v46  ;;  %v1111_v12 = vsel %vm1110_vm7, %v1682_v57, %v1107_v43  ;;  %v1371_v13 = vadd.f32 %v1684_v0, %v1370_v8  ;;  %v1596_v48 = vmul.f32 -1.442695, %v1322_v6  ;;  %v2956_v43 = vld [vmem:[#allocation45_spill] sm:$0xff] }
 0x4cf   :  { %v1116_v44 = vsel %vm1113_vm9, %v1115_v35, %v1111_v12  ;;  %v2805_v45 = vadd.f32 1.0, %v1692_v9  ;;  %v1119_v17 = vmul.f32 %v1097_v10, %v2761_v36  ;;  %v247_v11 = vadd.f32 %v2956_v43, %v2946_v2  ;;  %v2958_v43 = vld [vmem:[#allocation46_spill] sm:$0xff] }
 0x4d0   :  { %v1120_v49 = vmul.f32 %v1690_v3, %v1116_v44  ;;  %v1375_v18 = vsel %vm1374_vm11, %v1684_v0, %v1371_v13 }
 0x4d1   :  { %1695 = vrcp.f32 %v2805_v45  ;;  %v1694_v50 = vpop.eup %1693  ;;  %v1380_v21 = vsel %vm1377_vm12, %v1379_v16, %v1375_v18  ;;  %v1406_v5 = vand.u32 2147483647, %v2805_v45  ;;  %v1408_v0 = vand.u32 2147483648, %v2805_v45 }
 0x4d2   :  { %1697 = vpow2.f32 %v1596_v48  ;;  %v2811_v52 = vadd.f32 %v1120_v49, %v1119_v17  ;;  %v1487_v22 = vmul.f32 %v1688_v7, %v1380_v21  ;;  %v1383_v53 = vmul.f32 %v1694_v50, %v2794_v29 }
 0x4d3   :  { %v1307_v23 = vpop.f32.mrf.mxu0  ;;  %1699 = vtanh.f32 %v2465_v1  ;;  %vm1388_vm13 = vweird.f32 %v1694_v50  ;;  %v1394_v1 = vor.u32 1.1754944e-38, %v1393_v26  ;;  %vm1402_vm2 = vweird.f32 %v2805_v45 }
 0x4d4   :  { %v1323_v54 = vadd.f32 %v1307_v23, %v241_v51  ;;  %1146 = vmatmul.f32.vlgmr.msrb.gmra.mxu1 %v2811_v52  ;;  %1166 = vmatmul.f32.vlgmr.msrb.gmra.mxu2 %v2811_v52  ;;  %1495 = vst [vmem:[#allocation7] sm:$0xff] %v1487_v22  ;;  %v1384_v25 = vsub.f32 1.0, %v1383_v53  ;;  %vm1389_vm15 = vmor %vm1387_vm14, %vm1388_vm13  ;;  %vm1407_vm4 = vcmp.eq.f32.partialorder %v1406_v5, 8.507059e+37 }
 0x4d5   :  { %1186 = vmatmul.f32.vlgmr.msrb.gmra.mxu3 %v2811_v52  ;;  %1315 = vmatmul.f32.gmra.mxu0 %v2811_v52 }
 0x4d6   :  { %v1597_v56 = vmul.f32 -1.442695, %v1323_v54  ;;  %v1385_v57 = vmul.f32 %v1694_v50, %v1384_v25 }
 0x4d7   :  { %v1696_v27 = vpop.eup %1695 }
 0x4d8   :  { %v1698_v28 = vpop.eup %1697  ;;  %v1398_v58 = vmul.f32 %v1696_v27, %v2805_v45  ;;  %1701 = vpow2.f32 %v1597_v56  ;;  %v1386_v31 = vadd.f32 %v1694_v50, %v1385_v57  ;;  %vm1403_vm1 = vweird.f32 %v1696_v27 }
 0x4d9   :  { %v1362_v4 = vadd.f32 1.0, %v1698_v28  ;;  %1703 = vtanh.f32 %v2523_v47  ;;  %v1700_v61 = vpop.eup %1699  ;;  %vm1404_vm3 = vmor %vm1402_vm2, %vm1403_vm1  ;;  %v1409_v47 = vor.u32 1.1754944e-38, %v1408_v0 }
 0x4da   :  { %v1399_v42 = vsub.f32 1.0, %v1398_v58  ;;  %v1390_v19 = vsel %vm1389_vm15, %v1694_v50, %v1386_v31 }
 0x4db   :  { %1705 = vrcp.f32 %v1362_v4  ;;  %v1310_v24 = vpop.f32.mrf.mxu0  ;;  %v1395_v62 = vsel %vm1392_vm0, %v1394_v1, %v1390_v19  ;;  %v1423_v9 = vand.u32 2147483648, %v1362_v4  ;;  %v1421_v44 = vand.u32 2147483647, %v1362_v4 }
 0x4dc   :  { %v1400_v63 = vmul.f32 %v1696_v27, %v1399_v42  ;;  %v1324_v34 = vadd.f32 %v1310_v24, %v244_v59  ;;  %v1488_v14 = vmul.f32 %v1700_v61, %v1395_v62  ;;  %vm1417_vm6 = vweird.f32 %v1362_v4 }
 0x4dd   :  { %v1424_v2 = vor.u32 1.1754944e-38, %v1423_v9  ;;  %vm1422_vm8 = vcmp.eq.f32.partialorder %v1421_v44, 8.507059e+37 }
 0x4de   :  { %v1702_v39 = vpop.eup %1701  ;;  %v1401_v29 = vadd.f32 %v1696_v27, %v1400_v63  ;;  %v1598_v7 = vmul.f32 -1.442695, %v1324_v34  ;;  %1496 = vst [vmem:[#allocation7 + $0x8] sm:$0xff] %v1488_v14 }
 0x4df   :  { %v1363_v32 = vadd.f32 1.0, %v1702_v39  ;;  %v1704_v33 = vpop.eup %1703 }
 0x4e0   :  { %v1405_v35 = vsel %vm1404_vm3, %v1696_v27, %v1401_v29  ;;  %1707 = vpow2.f32 %v1598_v7 }
 0x4e1   :  { %v1706_v37 = vpop.eup %1705  ;;  %v1410_v38 = vsel %vm1407_vm4, %v1409_v47, %v1405_v35  ;;  %1709 = vrcp.f32 %v1363_v32  ;;  %v1438_v20 = vand.u32 2147483648, %v1363_v32  ;;  %v1436_v22 = vand.u32 2147483647, %v1363_v32 }
 0x4e2   :  { %v1489_v60 = vmul.f32 %v1704_v33, %v1410_v38  ;;  %v1413_v3 = vmul.f32 %v1706_v37, %v1362_v4  ;;  %1711 = vtanh.f32 %v2645_v40  ;;  %vm1418_vm5 = vweird.f32 %v1706_v37 }
 0x4e3   :  { %v1313_v46 = vpop.f32.mrf.mxu0  ;;  %vm1419_vm7 = vmor %vm1417_vm6, %vm1418_vm5  ;;  %vm1432_vm10 = vweird.f32 %v1363_v32  ;;  %v1439_v25 = vor.u32 1.1754944e-38, %v1438_v20  ;;  %vm1437_vm12 = vcmp.eq.f32.partialorder %v1436_v22, 8.507059e+37 }
 0x4e4   :  { %1497 = vst [vmem:[#allocation7 + $0x10] sm:$0xff] %v1489_v60  ;;  %v1414_v8 = vsub.f32 1.0, %v1413_v3  ;;  %v1325_v6 = vadd.f32 %v1313_v46, %v247_v11 }
 0x4e6   :  { %v1708_v10 = vpop.eup %1707  ;;  %v1415_v12 = vmul.f32 %v1706_v37, %v1414_v8  ;;  %v1599_v13 = vmul.f32 -1.442695, %v1325_v6  ;;  %v2959_v8 = vld [vmem:[#allocation35_spill] sm:$0xff] }
 0x4e7   :  { %v1710_v45 = vpop.eup %1709  ;;  %v1364_v16 = vadd.f32 1.0, %v1708_v10 }
 0x4e8   :  { %v1416_v48 = vadd.f32 %v1706_v37, %v1415_v12  ;;  %v1428_v17 = vmul.f32 %v1710_v45, %v1363_v32  ;;  %1713 = vpow2.f32 %v1599_v13  ;;  %v1712_v50 = vpop.eup %1711  ;;  %vm1433_vm9 = vweird.f32 %v1710_v45  ;;  %v2957_v32 = vld [vmem:[#allocation38_spill] sm:$0xff] }
 0x4e9   :  { %1715 = vrcp.f32 %v1364_v16  ;;  %vm1434_vm11 = vmor %vm1432_vm10, %vm1433_vm9  ;;  %v1453_v58 = vand.u32 2147483648, %v1364_v16  ;;  %v1451_v59 = vand.u32 2147483647, %v1364_v16  ;;  %vm1447_vm14 = vweird.f32 %v1364_v16 }
 0x4ea   :  { %v1420_v49 = vsel %vm1419_vm7, %v1706_v37, %v1416_v48  ;;  %v1429_v18 = vsub.f32 1.0, %v1428_v17  ;;  %1717 = vtanh.f32 %v2735_v41  ;;  %v127_v33 = vadd.f32 %v2957_v32, %v2930_v15 }
 0x4eb   :  { %v1425_v40 = vsel %vm1422_vm8, %v1424_v2, %v1420_v49  ;;  %v1454_v1 = vor.u32 1.1754944e-38, %v1453_v58  ;;  %vm1452_vm0 = vcmp.eq.f32.partialorder %v1451_v59, 8.507059e+37 }
 0x4ec   :  { %v1490_v51 = vmul.f32 %v1712_v50, %v1425_v40  ;;  %v1430_v21 = vmul.f32 %v1710_v45, %v1429_v18  ;;  %v2960_v40 = vld [vmem:[#allocation33_spill] sm:$0xff] }
 0x4ee   :  { %v1714_v53 = vpop.eup %1713  ;;  %1498 = vst [vmem:[#allocation7 + $0x18] sm:$0xff] %v1490_v51  ;;  %v1431_v23 = vadd.f32 %v1710_v45, %v1430_v21 }
 0x4ef   :  { %v1716_v54 = vpop.eup %1715  ;;  %v1365_v55 = vadd.f32 1.0, %v1714_v53 }
 0x4f0   :  { %v1435_v26 = vsel %vm1434_vm11, %v1710_v45, %v1431_v23  ;;  %v1443_v56 = vmul.f32 %v1716_v54, %v1364_v16  ;;  %v1718_v27 = vpop.eup %1717  ;;  %vm1448_vm13 = vweird.f32 %v1716_v54 }
 0x4f1   :  { %v1440_v57 = vsel %vm1437_vm12, %v1439_v25, %v1435_v26  ;;  %1719 = vrcp.f32 %v1365_v55  ;;  %vm1449_vm15 = vmor %vm1447_vm14, %vm1448_vm13  ;;  %v1466_v63 = vand.u32 2147483647, %v1365_v55  ;;  %vm1462_vm2 = vweird.f32 %v1365_v55 }
 0x4f2   :  { %v1491_v41 = vmul.f32 %v1718_v27, %v1440_v57  ;;  %v1444_v28 = vsub.f32 1.0, %v1443_v56  ;;  %1721 = vtanh.f32 %v2761_v36  ;;  %v1468_v36 = vand.u32 2147483648, %v1365_v55 }
 0x4f3   :  { %1723 = vtanh.f32 %v2811_v52  ;;  %vm1467_vm4 = vcmp.eq.f32.partialorder %v1466_v63, 8.507059e+37 }
 0x4f4   :  { %1499 = vst [vmem:[#allocation7 + $0x20] sm:$0xff] %v1491_v41  ;;  %v1445_v30 = vmul.f32 %v1716_v54, %v1444_v28  ;;  %v1469_v14 = vor.u32 1.1754944e-38, %v1468_v36 }
 0x4f6   :  { %v1446_v31 = vadd.f32 %v1716_v54, %v1445_v30 }
 0x4f7   :  { %v1720_v4 = vpop.eup %1719 }
 0x4f8   :  { %v1450_v42 = vsel %vm1449_vm15, %v1716_v54, %v1446_v31  ;;  %v1458_v19 = vmul.f32 %v1720_v4, %v1365_v55  ;;  %v1722_v5 = vpop.eup %1721  ;;  %vm1463_vm1 = vweird.f32 %v1720_v4 }
 0x4f9   :  { %v1455_v0 = vsel %vm1452_vm0, %v1454_v1, %v1450_v42  ;;  %vm1464_vm3 = vmor %vm1462_vm2, %vm1463_vm1  ;;  %v1724_v29 = vpop.eup %1723 }
 0x4fa   :  { %v1492_v24 = vmul.f32 %v1722_v5, %v1455_v0  ;;  %v1459_v61 = vsub.f32 1.0, %v1458_v19 }
 0x4fc   :  { %1500 = vst [vmem:[#allocation7 + $0x28] sm:$0xff] %v1492_v24  ;;  %v1460_v62 = vmul.f32 %v1720_v4, %v1459_v61 }
 0x4fe   :  { %v1461_v34 = vadd.f32 %v1720_v4, %v1460_v62 }
 0x500   :  { %v1465_v39 = vsel %vm1464_vm3, %v1720_v4, %v1461_v34 }
 0x501   :  { %v1470_v7 = vsel %vm1467_vm4, %v1469_v14, %v1465_v39 }
 0x502   :  { %v1493_v47 = vmul.f32 %v1724_v29, %v1470_v7 }
 0x504   :  { %1501 = vst [vmem:[#allocation7 + $0x30] sm:$0xff] %v1493_v47 }
 0x551   :  { %v1147_v35 = vpop.f32.mrf.mxu1 }
 0x552   :  { %v1190_v37 = vadd.f32 %v1147_v35, %v127_v33  ;;  %v1316_v38 = vpop.f32.mrf.mxu0 }
 0x553   :  { %v1326_v11 = vadd.f32 %v1316_v38, %v2958_v43 }
 0x554   :  { %v1591_v60 = vmul.f32 -1.442695, %v1190_v37 }
 0x555   :  { %v1600_v3 = vmul.f32 -1.442695, %v1326_v11 }
 0x556   :  { %1725 = vpow2.f32 %v1591_v60 }
 0x557   :  { %1727 = vpow2.f32 %v1600_v3  ;;  %v1167_v46 = vpop.f32.mrf.mxu2 }
 0x558   :  { %v1191_v6 = vadd.f32 %v1167_v46, %v2959_v8  ;;  %v1187_v2 = vpop.f32.mrf.mxu3 }
 0x559   :  { %v1192_v20 = vadd.f32 %v1187_v2, %v2960_v40 }
 0x55a   :  { %v1592_v9 = vmul.f32 -1.442695, %v1191_v6 }
 0x55c   :  { %v1726_v10 = vpop.eup %1725  ;;  %1729 = vpow2.f32 %v1592_v9 }
 0x55d   :  { %v1728_v12 = vpop.eup %1727  ;;  %v1196_v44 = vadd.f32 1.0, %v1726_v10 }
 0x55e   :  { %v2839_v13 = vadd.f32 1.0, %v1728_v12 }
 0x55f   :  { %1731 = vrcp.f32 %v1196_v44  ;;  %v1208_v22 = vand.u32 2147483648, %v1196_v44  ;;  %vm1202_vm6 = vweird.f32 %v1196_v44  ;;  %v1206_v54 = vand.u32 2147483647, %v1196_v44 }
 0x560   :  { %1733 = vrcp.f32 %v2839_v13  ;;  %v1483_v0 = vand.u32 2147483648, %v2839_v13  ;;  %vm1477_vm14 = vweird.f32 %v2839_v13  ;;  %v1481_v24 = vand.u32 2147483647, %v2839_v13 }
 0x561   :  { %v1209_v27 = vor.u32 1.1754944e-38, %v1208_v22  ;;  %vm1207_vm9 = vcmp.eq.f32.partialorder %v1206_v54, 8.507059e+37 }
 0x562   :  { %v1730_v15 = vpop.eup %1729  ;;  %vm1482_vm0 = vcmp.eq.f32.partialorder %v1481_v24, 8.507059e+37 }
 0x563   :  { %v1215_v45 = vadd.f32 1.0, %v1730_v15 }
 0x565   :  { %v1732_v16 = vpop.eup %1731  ;;  %1735 = vrcp.f32 %v1215_v45  ;;  %v1227_v25 = vand.u32 2147483648, %v1215_v45  ;;  %v1225_v56 = vand.u32 2147483647, %v1215_v45  ;;  %vm1221_vm10 = vweird.f32 %v1215_v45 }
 0x566   :  { %v1198_v48 = vmul.f32 %v1732_v16, %v1196_v44  ;;  %v1734_v49 = vpop.eup %1733  ;;  %vm1203_vm5 = vweird.f32 %v1732_v16  ;;  %1737 = vtanh.f32 %v1192_v20 }
 0x567   :  { %v1473_v53 = vmul.f32 %v1734_v49, %v2839_v13  ;;  %vm1204_vm7 = vmor %vm1202_vm6, %vm1203_vm5  ;;  %v1228_v58 = vor.u32 1.1754944e-38, %v1227_v25  ;;  %vm1226_vm12 = vcmp.eq.f32.partialorder %v1225_v56, 8.507059e+37  ;;  %vm1478_vm13 = vweird.f32 %v1734_v49 }
 0x568   :  { %v1199_v17 = vsub.f32 1.0, %v1198_v48  ;;  %vm1479_vm15 = vmor %vm1477_vm14, %vm1478_vm13 }
 0x569   :  { %v1474_v57 = vsub.f32 1.0, %v1473_v53 }
 0x56a   :  { %v1200_v18 = vmul.f32 %v1732_v16, %v1199_v17 }
 0x56b   :  { %v1736_v50 = vpop.eup %1735  ;;  %v1475_v31 = vmul.f32 %v1734_v49, %v1474_v57 }
 0x56c   :  { %v1217_v51 = vmul.f32 %v1736_v50, %v1215_v45  ;;  %v1201_v21 = vadd.f32 %v1732_v16, %v1200_v18  ;;  %vm1222_vm8 = vweird.f32 %v1736_v50  ;;  %v1738_v59 = vpop.eup %1737 }
 0x56d   :  { %vm1223_vm11 = vmor %vm1221_vm10, %vm1222_vm8  ;;  %v1476_v5 = vadd.f32 %v1734_v49, %v1475_v31 }
 0x56e   :  { %v1218_v23 = vsub.f32 1.0, %v1217_v51  ;;  %v1205_v55 = vsel %vm1204_vm7, %v1732_v16, %v1201_v21 }
 0x56f   :  { %v1210_v28 = vsel %vm1207_vm9, %v1209_v27, %v1205_v55  ;;  %v1480_v61 = vsel %vm1479_vm15, %v1734_v49, %v1476_v5 }
 0x570   :  { %v1219_v26 = vmul.f32 %v1736_v50, %v1218_v23  ;;  %v1232_v1 = vmul.f32 %v1210_v28, %v2811_v52  ;;  %v1484_v52 = vor.u32 1.1754944e-38, %v1483_v0 }
 0x572   :  { %v1220_v41 = vadd.f32 %v1736_v50, %v1219_v26  ;;  %v1485_v62 = vsel %vm1482_vm0, %v1484_v52, %v1480_v61 }
 0x574   :  { %v1224_v30 = vsel %vm1223_vm11, %v1736_v50, %v1220_v41 }
 0x575   :  { %v1229_v4 = vsel %vm1226_vm12, %v1228_v58, %v1224_v30 }
 0x576   :  { %v1233_v42 = vmul.f32 %v1738_v59, %v1229_v4 }
 0x578   :  { %v1234_v19 = vadd.f32 %v1233_v42, %v1232_v1 }
 0x57a   :  { %1739 = vtanh.f32 %v1234_v19  ;;  %1237 = vst [vmem:[#allocation8] sm:$0xff] %v1234_v19 }
 0x57b   :  { %1526 = dma.vmem_to_hbm [thread:$0]  %s1522_s2, 128, %s1524_s8, [#allocation9]  }
 0x580   :  { %v1740_v36 = vpop.eup %1739 }
 0x581   :  { %v1494_v63 = vmul.f32 %v1740_v36, %v1485_v62 }
 0x583   :  { %1502 = vst [vmem:[#allocation7 + $0x38] sm:$0xff] %v1494_v63 }
 0x584   :  { %1515 = dma.vmem_to_hbm [thread:$0]  %s1508_s9, 1024, %s1510_s12, [#allocation6], %s1873_s13, %s1873_s13, %s1874_s14  }
 0x585   :  { %1863 = dma.done.wait [#allocation6], 1024  }
 0x586   :  { %1864 = vsyncadd [#allocation6], 4294966272 }
 0x587   :  { %1865 = dma.done.wait [#allocation9], 128  }
 0x588   :  { %1866 = vsyncadd [#allocation9], 4294967168 }
 0x589   :  { %1535 = vsyncpa [#allocation5], 1 }
 0x58a   :  { %1536 = vsyncpa [#allocation6], 1 }
 0x58b   :  { %1537 = vsyncpa [#allocation9], 1 }

</bundles_post_ra>
